<compile_context>
chip_gen: v7x
topology: tpu7x:2x2x1
jax: 0.10.0
libtpu: 0.0.40
codegen_flags: <defaults>
</compile_context>

<pallas_src>
import jax
import jax.numpy as jnp
from jax.experimental import pallas as pl
from jax.experimental.pallas import tpu as pltpu


# (Ci, Co, pad_h, bf16_mxu) of the equivalent stride-1, kernel-height-2 conv per layer.
# ConvTranspose2d(k=2, stride=1, pad=p)  ==  Conv2d with flipped taps and pad = 1 - p.
_LAYERS = (
    (1, 256, 1, False),   # enc1: Conv2d(1, 256, (2,1), padding=(1,0))
    (256, 128, 0, True),  # enc2  (bf16 MXU inputs, ~45% of model FLOPs)
    (128, 32, 0, False),  # enc3
    (32, 1, 0, False),    # enc4                                     -> encoded
    (1, 32, 1, False),    # dec1: ConvTranspose2d(1, 32)             == conv, pad 1
    (32, 128, 1, False),  # dec2
    (128, 256, 1, True),  # dec3  (bf16 MXU inputs, ~40% of model FLOPs)
    (256, 1, 0, False),   # dec4: ConvTranspose2d(256, 1, pad=(1,0)) == conv, pad 0 -> decoded
)
_ENC_LAYER = 3            # index of the layer whose output is `encoded`
_W_COLS = 256             # lane width of the packed weight / bias buffers


def _round8(n):
    return (n + 7) // 8 * 8


def _weight_rows(ci, co):
    return 2 if (ci == 1 or co == 1) else 2 * ci


def _pack_layout():
    offs, off = [], 0
    for ci, co, _, _ in _LAYERS:
        offs.append(off)
        off += _round8(_weight_rows(ci, co))      # 8-aligned row offsets
    return tuple(offs), off


_W_OFFS, _W_ROWS = _pack_layout()                  # offsets: (0,8,520,776,784,792,856,1112)


def _out_heights(H):
    hs, h = [], H
    for _, _, pad, _ in _LAYERS:
        h = h + 2 * pad - 1                        # kernel height 2, stride 1
        hs.append(h)
    return hs


# ----------------------------------------------------------------------------- kernel
def _ae_fused_kernel(x_ref, w_ref, b_ref, enc_ref, dec_ref):
    """All 8 layers for one batch block, fully resident in VMEM."""
    nb = x_ref.shape[0]

    def layer(x, idx):
        # x: (nb, Hin, W, ci) f32 value, channels on lanes.
        # Returns (y4 (nb, Hout, W, co) for the next layer, y3 (nb, Hout, W) or None).
        ci, co, pad, use_bf16 = _LAYERS[idx]
        off = _W_OFFS[idx]
        if pad:
            z = jnp.zeros((nb, 1, x.shape[2], ci), x.dtype)
            x = jnp.concatenate([z, x, z], axis=1)
        hout = x.shape[1] - 1
        x0 = x[:, :hout]                           # tap at h
        x1 = x[:, 1:]                              # tap at h + 1 (same in-VMEM data)

        if ci == 1:
            # VPU outer product.
            w0 = w_ref[off:off + 1, :co]           # (1, co)
            w1 = w_ref[off + 1:off + 2, :co]
            b = b_ref[idx:idx + 1, :co]
            return x0 * w0 + x1 * w1 + b, None

        if co == 1:
            # VPU multiply + XLU lane reduction; also produce the lane-denser
            # (nb, hout, W) form used for the output stores.
            w0 = w_ref[off:off + 1, :ci]           # (1, ci)
            w1 = w_ref[off + 1:off + 2, :ci]
            b = b_ref[idx:idx + 1, 0:1]            # (1, 1) scalar bias
            s = x0 * w0 + x1 * w1                  # (nb, hout, W, ci)
            y4 = jnp.sum(s, axis=-1, keepdims=True) + b   # feeds the next layer
            y3 = jnp.sum(s, axis=-1) + b                  # dense store form
            return y4, y3

        # MXU path: two accumulated dots (no K-concat copy).
        w0 = w_ref[off:off + ci, :co]
        w1 = w_ref[off + ci:off + 2 * ci, :co]
        b = b_ref[idx:idx + 1, :co]
        m = nb * hout * x.shape[2]
        x0f = x0.reshape(m, ci)
        x1f = x1.reshape(m, ci)
        if use_bf16:
            x0f = x0f.astype(jnp.bfloat16)
            x1f = x1f.astype(jnp.bfloat16)
            w0 = w0.astype(jnp.bfloat16)
            w1 = w1.astype(jnp.bfloat16)
        y = (jnp.dot(x0f, w0, preferred_element_type=jnp.float32)
             + jnp.dot(x1f, w1, preferred_element_type=jnp.float32) + b)
        return y.reshape(nb, hout, x.shape[2], co), None

    h = x_ref[...]                                 # (nb, H, W, 1)
    dense = None
    for idx in range(len(_LAYERS)):
        h, dense = layer(h, idx)
        if idx == _ENC_LAYER:
            enc_ref[...] = dense                   # (nb, enc_h, W)
    dec_ref[...] = dense                           # (nb, dec_h, W)


# ----------------------------------------------------------------------------- wrapper
def autoencoder_forward(x_nchw, w_packed, b_packed, batch_block=None):
    """x_nchw: (N, 1, H, W) f32 -> (encoded (N,1,He,W), decoded (N,1,Hd,W))."""
    N, C, H, W = x_nchw.shape
    assert C == 1
    x = x_nchw.reshape(N, H, W, 1)                 # channels-last, C == 1 (free reshape)

    if batch_block is None:
        # >= 2 grid blocks keeps both TensorCores busy on v7x; for larger N each block
        # folds batch_block images into the matmul M dimension (v5e/v6e MXU fill).
        batch_block = max(1, N // 2)
    assert N % batch_block == 0
    grid = (N // batch_block,)

    hs = _out_heights(H)
    enc_h, dec_h = hs[_ENC_LAYER], hs[-1]

    enc, dec = pl.pallas_call(
        _ae_fused_kernel,
        out_shape=(jax.ShapeDtypeStruct((N, enc_h, W), jnp.float32),
                   jax.ShapeDtypeStruct((N, dec_h, W), jnp.float32)),
        grid_spec=pltpu.PrefetchScalarGridSpec(
            num_scalar_prefetch=0,
            grid=grid,
            in_specs=[
                pl.BlockSpec((batch_block, H, W, 1), lambda n: (n, 0, 0, 0)),
                # Packed weights / biases: one block, constant index_map -> fetched once.
                pl.BlockSpec((_W_ROWS, _W_COLS), lambda n: (0, 0)),
                pl.BlockSpec((len(_LAYERS), _W_COLS), lambda n: (0, 0)),
            ],
            out_specs=[
                pl.BlockSpec((batch_block, enc_h, W), lambda n: (n, 0, 0)),
                pl.BlockSpec((batch_block, dec_h, W), lambda n: (n, 0, 0)),
            ],
        ),
        compiler_params=pltpu.CompilerParams(
            dimension_semantics=("parallel",),     # batch blocks across both TCs on v7x
            vmem_limit_bytes=32 * 1024 * 1024,
        ),
    )(x, w_packed, b_packed)

    return enc.reshape(N, 1, enc_h, W), dec.reshape(N, 1, dec_h, W)


# --------------------------------------------------------------------------- parameters
def init_params(key):
    """Deterministic synthetic parameters matching the PyTorch module shapes."""
    enc_dims = [(1, 256), (256, 128), (128, 32), (32, 1)]
    enc_pads = [1, 0, 0, 0]
    dec_dims = [(1, 32), (32, 128), (128, 256), (256, 1)]
    dec_pads = [0, 0, 0, 1]

    keys = iter(jax.random.split(key, 32))
    raw = {"enc": [], "dec": []}                   # PyTorch-layout weights (for reference)
    taps = []                                      # (tap0 (Ci,Co), tap1 (Ci,Co), bias)

    for (ci, co), p in zip(enc_dims, enc_pads):
        bound = 1.0 / (2.0 * ci) ** 0.5
        w = jax.random.uniform(next(keys), (co, ci, 2, 1), jnp.float32, -bound, bound)
        b = jax.random.uniform(next(keys), (co,), jnp.float32, -bound, bound)
        raw["enc"].append((w, b, p))
        taps.append((w[:, :, 0, 0].T, w[:, :, 1, 0].T, b))

    for (ci, co), p in zip(dec_dims, dec_pads):
        bound = 1.0 / (2.0 * ci) ** 0.5
        w = jax.random.uniform(next(keys), (ci, co, 2, 1), jnp.float32, -bound, bound)
        b = jax.random.uniform(next(keys), (co,), jnp.float32, -bound, bound)
        raw["dec"].append((w, b, p))
        # ConvTranspose2d(stride=1, pad=p, k=2) == Conv2d with flipped taps, pad = 1 - p
        taps.append((w[:, :, 1, 0], w[:, :, 0, 0], b))

    # Pack all 16 weight/bias arrays into two lane-aligned buffers (kernel slices them
    # at the static 8-aligned row offsets in _W_OFFS).
    w_packed = jnp.zeros((_W_ROWS, _W_COLS), jnp.float32)
    b_packed = jnp.zeros((len(_LAYERS), _W_COLS), jnp.float32)
    for idx, ((ci, co, _, _), (wa, wb, b)) in enumerate(zip(_LAYERS, taps)):
        off = _W_OFFS[idx]
        if ci == 1:
            w2 = jnp.concatenate([wa, wb], axis=0)          # (2, co):   row k = tap k
        elif co == 1:
            w2 = jnp.concatenate([wa.T, wb.T], axis=0)      # (2, ci):   row k = tap k
        else:
            w2 = jnp.concatenate([wa, wb], axis=0)          # (2*ci, co): rows [0,ci)=tap0
        w_packed = w_packed.at[off:off + w2.shape[0], :w2.shape[1]].set(w2)
        b_packed = b_packed.at[idx, :b.shape[0]].set(b)
    return raw, w_packed, b_packed


# ------------------------------------------------------------------ pure-JAX reference
def reference_forward(x_nchw, raw):
    h = x_nchw
    for w, b, p in raw["enc"]:
        h = jax.lax.conv_general_dilated(
            h, w, window_strides=(1, 1), padding=[(p, p), (0, 0)],
            dimension_numbers=("NCHW", "OIHW", "NCHW")) + b.reshape(1, -1, 1, 1)
    encoded = h
    for w, b, p in raw["dec"]:
        w_eq = jnp.flip(jnp.transpose(w, (1, 0, 2, 3)), axis=(2, 3))
        h = jax.lax.conv_general_dilated(
            h, w_eq, window_strides=(1, 1), padding=[(1 - p, 1 - p), (0, 0)],
            dimension_numbers=("NCHW", "OIHW", "NCHW")) + b.reshape(1, -1, 1, 1)
    return encoded, h


# --------------------------------------------------------------------------------- main
if __name__ == "__main__":
    key = jax.random.PRNGKey(0)
    k_param, k_x = jax.random.split(key)
    raw, w_packed, b_packed = init_params(k_param)

    # small NCHW input consistent with Conv2d(1, ...): N=2, C=1, H=16, W=8
    x = jax.random.normal(k_x, (2, 1, 16, 8), dtype=jnp.float32)

    fwd = jax.jit(autoencoder_forward)
    encoded, decoded = fwd(x, w_packed, b_packed)
    encoded = jax.block_until_ready(encoded)
    decoded = jax.block_until_ready(decoded)

    assert encoded.shape == (2, 1, 14, 8), encoded.shape
    assert decoded.shape == (2, 1, 16, 8), decoded.shape

    enc_ref, dec_ref = reference_forward(x, raw)
    # bf16 MXU inputs on enc2/dec3 keep errors ~1e-4 (f32 accumulation, f32 elsewhere):
    # the original 1e-3 tolerance is preserved.
    assert jnp.allclose(encoded, enc_ref, rtol=1e-3, atol=1e-3), (
        float(jnp.max(jnp.abs(encoded - enc_ref))))
    assert jnp.allclose(decoded, dec_ref, rtol=1e-3, atol=1e-3), (
        float(jnp.max(jnp.abs(decoded - dec_ref))))

    print("KERNEL_OK")
</pallas_src>

<mosaic_0001>
module attributes {stable_mosaic.version = 11 : i64} {
  func.func @_ae_fused_kernel(%arg0: i32, %arg1: memref<1x16x8x1xf32, #tpu.memory_space<vmem>>, %arg2: memref<1120x256xf32, #tpu.memory_space<vmem>>, %arg3: memref<8x256xf32, #tpu.memory_space<vmem>>, %arg4: memref<1x14x8xf32, #tpu.memory_space<vmem>>, %arg5: memref<1x16x8xf32, #tpu.memory_space<vmem>>) attributes {dimension_semantics = [#tpu.dimension_semantics<parallel>], iteration_bounds = array<i64: 2>, scalar_prefetch = 0 : i64, scratch_operands = 0 : i64, tpu.core_type = #tpu.core_type<tc>, window_params = [{transform_indices = @transform_0, window_bounds = array<i64: 1, 16, 8, 1>}, {pipeline_mode = #tpu.pipeline_mode<synchronous>, transform_indices = @transform_1, window_bounds = array<i64: 1120, 256>}, {pipeline_mode = #tpu.pipeline_mode<synchronous>, transform_indices = @transform_2, window_bounds = array<i64: 8, 256>}, {transform_indices = @transform_3, window_bounds = array<i64: 1, 14, 8>}, {transform_indices = @transform_4, window_bounds = array<i64: 1, 16, 8>}]} {
    %c0 = arith.constant 0 : index
    %c0_0 = arith.constant 0 : index
    %c0_1 = arith.constant 0 : index
    %c0_2 = arith.constant 0 : index
    %0 = vector.load %arg1[%c0, %c0_0, %c0_1, %c0_2] : memref<1x16x8x1xf32, #tpu.memory_space<vmem>>, vector<1x16x8x1xf32>
    %cst = arith.constant 0.000000e+00 : f32
    %1 = vector.broadcast %cst : f32 to vector<1x1x8x1xf32>
    %2 = tpu.concatenate %1, %0, %1 in 1 : vector<1x1x8x1xf32>, vector<1x16x8x1xf32>, vector<1x1x8x1xf32> -> vector<1x18x8x1xf32>
    %3 = vector.extract_strided_slice %2 {offsets = [0, 0, 0, 0], sizes = [1, 17, 8, 1], strides = [1, 1, 1, 1]} : vector<1x18x8x1xf32> to vector<1x17x8x1xf32>
    %4 = vector.extract_strided_slice %2 {offsets = [0, 1, 0, 0], sizes = [1, 17, 8, 1], strides = [1, 1, 1, 1]} : vector<1x18x8x1xf32> to vector<1x17x8x1xf32>
    %c0_3 = arith.constant 0 : index
    %c0_4 = arith.constant 0 : index
    %5 = vector.load %arg2[%c0_3, %c0_4] : memref<1120x256xf32, #tpu.memory_space<vmem>>, vector<1x256xf32>
    %c1 = arith.constant 1 : index
    %c0_5 = arith.constant 0 : index
    %6 = vector.load %arg2[%c1, %c0_5] : memref<1120x256xf32, #tpu.memory_space<vmem>>, vector<1x256xf32>
    %c0_6 = arith.constant 0 : index
    %c0_7 = arith.constant 0 : index
    %7 = vector.load %arg3[%c0_6, %c0_7] : memref<8x256xf32, #tpu.memory_space<vmem>>, vector<1x256xf32>
    %8 = vector.shape_cast %5 : vector<1x256xf32> to vector<1x1x1x256xf32>
    %9 = vector.broadcast %3 : vector<1x17x8x1xf32> to vector<1x17x8x256xf32>
    %10 = vector.broadcast %8 : vector<1x1x1x256xf32> to vector<1x17x8x256xf32>
    %11 = arith.mulf %9, %10 : vector<1x17x8x256xf32>
    %12 = vector.shape_cast %6 : vector<1x256xf32> to vector<1x1x1x256xf32>
    %13 = vector.broadcast %4 : vector<1x17x8x1xf32> to vector<1x17x8x256xf32>
    %14 = vector.broadcast %12 : vector<1x1x1x256xf32> to vector<1x17x8x256xf32>
    %15 = arith.mulf %13, %14 : vector<1x17x8x256xf32>
    %16 = arith.addf %11, %15 : vector<1x17x8x256xf32>
    %17 = vector.shape_cast %7 : vector<1x256xf32> to vector<1x1x1x256xf32>
    %18 = vector.broadcast %17 : vector<1x1x1x256xf32> to vector<1x17x8x256xf32>
    %19 = arith.addf %16, %18 : vector<1x17x8x256xf32>
    %20 = vector.extract_strided_slice %19 {offsets = [0, 0, 0, 0], sizes = [1, 16, 8, 256], strides = [1, 1, 1, 1]} : vector<1x17x8x256xf32> to vector<1x16x8x256xf32>
    %21 = vector.extract_strided_slice %19 {offsets = [0, 1, 0, 0], sizes = [1, 16, 8, 256], strides = [1, 1, 1, 1]} : vector<1x17x8x256xf32> to vector<1x16x8x256xf32>
    %c8 = arith.constant 8 : index
    %c0_8 = arith.constant 0 : index
    %22 = vector.load %arg2[%c8, %c0_8] : memref<1120x256xf32, #tpu.memory_space<vmem>>, vector<256x128xf32>
    %c264 = arith.constant 264 : index
    %c0_9 = arith.constant 0 : index
    %23 = vector.load %arg2[%c264, %c0_9] : memref<1120x256xf32, #tpu.memory_space<vmem>>, vector<256x128xf32>
    %c1_10 = arith.constant 1 : index
    %c0_11 = arith.constant 0 : index
    %24 = vector.load %arg3[%c1_10, %c0_11] : memref<8x256xf32, #tpu.memory_space<vmem>>, vector<1x128xf32>
    %25 = vector.shape_cast %20 : vector<1x16x8x256xf32> to vector<128x256xf32>
    %26 = vector.shape_cast %21 : vector<1x16x8x256xf32> to vector<128x256xf32>
    %27 = arith.truncf %25 : vector<128x256xf32> to vector<128x256xbf16>
    %28 = arith.truncf %26 : vector<128x256xf32> to vector<128x256xbf16>
    %29 = arith.truncf %22 : vector<256x128xf32> to vector<256x128xbf16>
    %30 = arith.truncf %23 : vector<256x128xf32> to vector<256x128xbf16>
    %cst_12 = arith.constant dense<0.000000e+00> : vector<128x128xf32>
    %31 = tpu.matmul %27, %29, %cst_12 {dimension_numbers = #tpu.dot_dimension_numbers<[1], [0], [0], [1], [0, 0, 1, 1], [], []>} : vector<128x256xbf16>, vector<256x128xbf16>, vector<128x128xf32> -> vector<128x128xf32>
    %cst_13 = arith.constant dense<0.000000e+00> : vector<128x128xf32>
    %32 = tpu.matmul %28, %30, %cst_13 {dimension_numbers = #tpu.dot_dimension_numbers<[1], [0], [0], [1], [0, 0, 1, 1], [], []>} : vector<128x256xbf16>, vector<256x128xbf16>, vector<128x128xf32> -> vector<128x128xf32>
    %33 = arith.addf %31, %32 : vector<128x128xf32>
    %34 = vector.broadcast %24 : vector<1x128xf32> to vector<128x128xf32>
    %35 = arith.addf %33, %34 : vector<128x128xf32>
    %36 = vector.shape_cast %35 : vector<128x128xf32> to vector<1x16x8x128xf32>
    %37 = vector.extract_strided_slice %36 {offsets = [0, 0, 0, 0], sizes = [1, 15, 8, 128], strides = [1, 1, 1, 1]} : vector<1x16x8x128xf32> to vector<1x15x8x128xf32>
    %38 = vector.extract_strided_slice %36 {offsets = [0, 1, 0, 0], sizes = [1, 15, 8, 128], strides = [1, 1, 1, 1]} : vector<1x16x8x128xf32> to vector<1x15x8x128xf32>
    %c520 = arith.constant 520 : index
    %c0_14 = arith.constant 0 : index
    %39 = vector.load %arg2[%c520, %c0_14] : memref<1120x256xf32, #tpu.memory_space<vmem>>, vector<128x32xf32>
    %c648 = arith.constant 648 : index
    %c0_15 = arith.constant 0 : index
    %40 = vector.load %arg2[%c648, %c0_15] : memref<1120x256xf32, #tpu.memory_space<vmem>>, vector<128x32xf32>
    %c2 = arith.constant 2 : index
    %c0_16 = arith.constant 0 : index
    %41 = vector.load %arg3[%c2, %c0_16] : memref<8x256xf32, #tpu.memory_space<vmem>>, vector<1x32xf32>
    %42 = vector.shape_cast %37 : vector<1x15x8x128xf32> to vector<120x128xf32>
    %43 = vector.shape_cast %38 : vector<1x15x8x128xf32> to vector<120x128xf32>
    %cst_17 = arith.constant dense<0.000000e+00> : vector<120x32xf32>
    %44 = tpu.matmul %42, %39, %cst_17 {dimension_numbers = #tpu.dot_dimension_numbers<[1], [0], [0], [1], [0, 0, 1, 1], [], []>} : vector<120x128xf32>, vector<128x32xf32>, vector<120x32xf32> -> vector<120x32xf32>
    %cst_18 = arith.constant dense<0.000000e+00> : vector<120x32xf32>
    %45 = tpu.matmul %43, %40, %cst_18 {dimension_numbers = #tpu.dot_dimension_numbers<[1], [0], [0], [1], [0, 0, 1, 1], [], []>} : vector<120x128xf32>, vector<128x32xf32>, vector<120x32xf32> -> vector<120x32xf32>
    %46 = arith.addf %44, %45 : vector<120x32xf32>
    %47 = vector.broadcast %41 : vector<1x32xf32> to vector<120x32xf32>
    %48 = arith.addf %46, %47 : vector<120x32xf32>
    %49 = vector.shape_cast %48 : vector<120x32xf32> to vector<1x15x8x32xf32>
    %50 = vector.extract_strided_slice %49 {offsets = [0, 0, 0, 0], sizes = [1, 14, 8, 32], strides = [1, 1, 1, 1]} : vector<1x15x8x32xf32> to vector<1x14x8x32xf32>
    %51 = vector.extract_strided_slice %49 {offsets = [0, 1, 0, 0], sizes = [1, 14, 8, 32], strides = [1, 1, 1, 1]} : vector<1x15x8x32xf32> to vector<1x14x8x32xf32>
    %c776 = arith.constant 776 : index
    %c0_19 = arith.constant 0 : index
    %52 = vector.load %arg2[%c776, %c0_19] : memref<1120x256xf32, #tpu.memory_space<vmem>>, vector<1x32xf32>
    %c777 = arith.constant 777 : index
    %c0_20 = arith.constant 0 : index
    %53 = vector.load %arg2[%c777, %c0_20] : memref<1120x256xf32, #tpu.memory_space<vmem>>, vector<1x32xf32>
    %c3 = arith.constant 3 : index
    %c0_21 = arith.constant 0 : index
    %54 = vector.load %arg3[%c3, %c0_21] : memref<8x256xf32, #tpu.memory_space<vmem>>, vector<1x1xf32>
    %55 = vector.shape_cast %52 : vector<1x32xf32> to vector<1x1x1x32xf32>
    %56 = vector.broadcast %55 : vector<1x1x1x32xf32> to vector<1x14x8x32xf32>
    %57 = arith.mulf %50, %56 : vector<1x14x8x32xf32>
    %58 = vector.shape_cast %53 : vector<1x32xf32> to vector<1x1x1x32xf32>
    %59 = vector.broadcast %58 : vector<1x1x1x32xf32> to vector<1x14x8x32xf32>
    %60 = arith.mulf %51, %59 : vector<1x14x8x32xf32>
    %61 = arith.addf %57, %60 : vector<1x14x8x32xf32>
    %cst_22 = arith.constant dense<0.000000e+00> : vector<1x14x8xf32>
    %62 = vector.multi_reduction <add>, %61, %cst_22 [3] : vector<1x14x8x32xf32> to vector<1x14x8xf32>
    %63 = vector.shape_cast %62 : vector<1x14x8xf32> to vector<1x14x8x1xf32>
    %64 = vector.shape_cast %54 : vector<1x1xf32> to vector<1x1x1x1xf32>
    %65 = vector.broadcast %64 : vector<1x1x1x1xf32> to vector<1x14x8x1xf32>
    %66 = arith.addf %63, %65 : vector<1x14x8x1xf32>
    %cst_23 = arith.constant dense<0.000000e+00> : vector<1x14x8xf32>
    %67 = vector.multi_reduction <add>, %61, %cst_23 [3] : vector<1x14x8x32xf32> to vector<1x14x8xf32>
    %68 = vector.shape_cast %54 : vector<1x1xf32> to vector<1x1x1xf32>
    %69 = vector.broadcast %68 : vector<1x1x1xf32> to vector<1x14x8xf32>
    %70 = arith.addf %67, %69 : vector<1x14x8xf32>
    %c0_24 = arith.constant 0 : index
    %c0_25 = arith.constant 0 : index
    %c0_26 = arith.constant 0 : index
    %71 = vector.load %arg4[%c0_24, %c0_25, %c0_26] : memref<1x14x8xf32, #tpu.memory_space<vmem>>, vector<1x14x8xf32>
    tpu.vector_store %arg4[%c0_24, %c0_25, %c0_26], %70 {strides = array<i32>} : memref<1x14x8xf32, #tpu.memory_space<vmem>>, vector<1x14x8xf32>,
    %cst_27 = arith.constant 0.000000e+00 : f32
    %72 = vector.broadcast %cst_27 : f32 to vector<1x1x8x1xf32>
    %73 = tpu.concatenate %72, %66, %72 in 1 : vector<1x1x8x1xf32>, vector<1x14x8x1xf32>, vector<1x1x8x1xf32> -> vector<1x16x8x1xf32>
    %74 = vector.extract_strided_slice %73 {offsets = [0, 0, 0, 0], sizes = [1, 15, 8, 1], strides = [1, 1, 1, 1]} : vector<1x16x8x1xf32> to vector<1x15x8x1xf32>
    %75 = vector.extract_strided_slice %73 {offsets = [0, 1, 0, 0], sizes = [1, 15, 8, 1], strides = [1, 1, 1, 1]} : vector<1x16x8x1xf32> to vector<1x15x8x1xf32>
    %c784 = arith.constant 784 : index
    %c0_28 = arith.constant 0 : index
    %76 = vector.load %arg2[%c784, %c0_28] : memref<1120x256xf32, #tpu.memory_space<vmem>>, vector<1x32xf32>
    %c785 = arith.constant 785 : index
    %c0_29 = arith.constant 0 : index
    %77 = vector.load %arg2[%c785, %c0_29] : memref<1120x256xf32, #tpu.memory_space<vmem>>, vector<1x32xf32>
    %c4 = arith.constant 4 : index
    %c0_30 = arith.constant 0 : index
    %78 = vector.load %arg3[%c4, %c0_30] : memref<8x256xf32, #tpu.memory_space<vmem>>, vector<1x32xf32>
    %79 = vector.shape_cast %76 : vector<1x32xf32> to vector<1x1x1x32xf32>
    %80 = vector.broadcast %74 : vector<1x15x8x1xf32> to vector<1x15x8x32xf32>
    %81 = vector.broadcast %79 : vector<1x1x1x32xf32> to vector<1x15x8x32xf32>
    %82 = arith.mulf %80, %81 : vector<1x15x8x32xf32>
    %83 = vector.shape_cast %77 : vector<1x32xf32> to vector<1x1x1x32xf32>
    %84 = vector.broadcast %75 : vector<1x15x8x1xf32> to vector<1x15x8x32xf32>
    %85 = vector.broadcast %83 : vector<1x1x1x32xf32> to vector<1x15x8x32xf32>
    %86 = arith.mulf %84, %85 : vector<1x15x8x32xf32>
    %87 = arith.addf %82, %86 : vector<1x15x8x32xf32>
    %88 = vector.shape_cast %78 : vector<1x32xf32> to vector<1x1x1x32xf32>
    %89 = vector.broadcast %88 : vector<1x1x1x32xf32> to vector<1x15x8x32xf32>
    %90 = arith.addf %87, %89 : vector<1x15x8x32xf32>
    %cst_31 = arith.constant 0.000000e+00 : f32
    %91 = vector.broadcast %cst_31 : f32 to vector<1x1x8x32xf32>
    %92 = tpu.concatenate %91, %90, %91 in 1 : vector<1x1x8x32xf32>, vector<1x15x8x32xf32>, vector<1x1x8x32xf32> -> vector<1x17x8x32xf32>
    %93 = vector.extract_strided_slice %92 {offsets = [0, 0, 0, 0], sizes = [1, 16, 8, 32], strides = [1, 1, 1, 1]} : vector<1x17x8x32xf32> to vector<1x16x8x32xf32>
    %94 = vector.extract_strided_slice %92 {offsets = [0, 1, 0, 0], sizes = [1, 16, 8, 32], strides = [1, 1, 1, 1]} : vector<1x17x8x32xf32> to vector<1x16x8x32xf32>
    %c792 = arith.constant 792 : index
    %c0_32 = arith.constant 0 : index
    %95 = vector.load %arg2[%c792, %c0_32] : memref<1120x256xf32, #tpu.memory_space<vmem>>, vector<32x128xf32>
    %c824 = arith.constant 824 : index
    %c0_33 = arith.constant 0 : index
    %96 = vector.load %arg2[%c824, %c0_33] : memref<1120x256xf32, #tpu.memory_space<vmem>>, vector<32x128xf32>
    %c5 = arith.constant 5 : index
    %c0_34 = arith.constant 0 : index
    %97 = vector.load %arg3[%c5, %c0_34] : memref<8x256xf32, #tpu.memory_space<vmem>>, vector<1x128xf32>
    %98 = vector.shape_cast %93 : vector<1x16x8x32xf32> to vector<128x32xf32>
    %99 = vector.shape_cast %94 : vector<1x16x8x32xf32> to vector<128x32xf32>
    %cst_35 = arith.constant dense<0.000000e+00> : vector<128x128xf32>
    %100 = tpu.matmul %98, %95, %cst_35 {dimension_numbers = #tpu.dot_dimension_numbers<[1], [0], [0], [1], [0, 0, 1, 1], [], []>} : vector<128x32xf32>, vector<32x128xf32>, vector<128x128xf32> -> vector<128x128xf32>
    %cst_36 = arith.constant dense<0.000000e+00> : vector<128x128xf32>
    %101 = tpu.matmul %99, %96, %cst_36 {dimension_numbers = #tpu.dot_dimension_numbers<[1], [0], [0], [1], [0, 0, 1, 1], [], []>} : vector<128x32xf32>, vector<32x128xf32>, vector<128x128xf32> -> vector<128x128xf32>
    %102 = arith.addf %100, %101 : vector<128x128xf32>
    %103 = vector.broadcast %97 : vector<1x128xf32> to vector<128x128xf32>
    %104 = arith.addf %102, %103 : vector<128x128xf32>
    %105 = vector.shape_cast %104 : vector<128x128xf32> to vector<1x16x8x128xf32>
    %cst_37 = arith.constant 0.000000e+00 : f32
    %106 = vector.broadcast %cst_37 : f32 to vector<1x1x8x128xf32>
    %107 = tpu.concatenate %106, %105, %106 in 1 : vector<1x1x8x128xf32>, vector<1x16x8x128xf32>, vector<1x1x8x128xf32> -> vector<1x18x8x128xf32>
    %108 = vector.extract_strided_slice %107 {offsets = [0, 0, 0, 0], sizes = [1, 17, 8, 128], strides = [1, 1, 1, 1]} : vector<1x18x8x128xf32> to vector<1x17x8x128xf32>
    %109 = vector.extract_strided_slice %107 {offsets = [0, 1, 0, 0], sizes = [1, 17, 8, 128], strides = [1, 1, 1, 1]} : vector<1x18x8x128xf32> to vector<1x17x8x128xf32>
    %c856 = arith.constant 856 : index
    %c0_38 = arith.constant 0 : index
    %110 = vector.load %arg2[%c856, %c0_38] : memref<1120x256xf32, #tpu.memory_space<vmem>>, vector<128x256xf32>
    %c984 = arith.constant 984 : index
    %c0_39 = arith.constant 0 : index
    %111 = vector.load %arg2[%c984, %c0_39] : memref<1120x256xf32, #tpu.memory_space<vmem>>, vector<128x256xf32>
    %c6 = arith.constant 6 : index
    %c0_40 = arith.constant 0 : index
    %112 = vector.load %arg3[%c6, %c0_40] : memref<8x256xf32, #tpu.memory_space<vmem>>, vector<1x256xf32>
    %113 = vector.shape_cast %108 : vector<1x17x8x128xf32> to vector<136x128xf32>
    %114 = vector.shape_cast %109 : vector<1x17x8x128xf32> to vector<136x128xf32>
    %115 = arith.truncf %113 : vector<136x128xf32> to vector<136x128xbf16>
    %116 = arith.truncf %114 : vector<136x128xf32> to vector<136x128xbf16>
    %117 = arith.truncf %110 : vector<128x256xf32> to vector<128x256xbf16>
    %118 = arith.truncf %111 : vector<128x256xf32> to vector<128x256xbf16>
    %cst_41 = arith.constant dense<0.000000e+00> : vector<136x256xf32>
    %119 = tpu.matmul %115, %117, %cst_41 {dimension_numbers = #tpu.dot_dimension_numbers<[1], [0], [0], [1], [0, 0, 1, 1], [], []>} : vector<136x128xbf16>, vector<128x256xbf16>, vector<136x256xf32> -> vector<136x256xf32>
    %cst_42 = arith.constant dense<0.000000e+00> : vector<136x256xf32>
    %120 = tpu.matmul %116, %118, %cst_42 {dimension_numbers = #tpu.dot_dimension_numbers<[1], [0], [0], [1], [0, 0, 1, 1], [], []>} : vector<136x128xbf16>, vector<128x256xbf16>, vector<136x256xf32> -> vector<136x256xf32>
    %121 = arith.addf %119, %120 : vector<136x256xf32>
    %122 = vector.broadcast %112 : vector<1x256xf32> to vector<136x256xf32>
    %123 = arith.addf %121, %122 : vector<136x256xf32>
    %124 = vector.shape_cast %123 : vector<136x256xf32> to vector<1x17x8x256xf32>
    %125 = vector.extract_strided_slice %124 {offsets = [0, 0, 0, 0], sizes = [1, 16, 8, 256], strides = [1, 1, 1, 1]} : vector<1x17x8x256xf32> to vector<1x16x8x256xf32>
    %126 = vector.extract_strided_slice %124 {offsets = [0, 1, 0, 0], sizes = [1, 16, 8, 256], strides = [1, 1, 1, 1]} : vector<1x17x8x256xf32> to vector<1x16x8x256xf32>
    %c1112 = arith.constant 1112 : index
    %c0_43 = arith.constant 0 : index
    %127 = vector.load %arg2[%c1112, %c0_43] : memref<1120x256xf32, #tpu.memory_space<vmem>>, vector<1x256xf32>
    %c1113 = arith.constant 1113 : index
    %c0_44 = arith.constant 0 : index
    %128 = vector.load %arg2[%c1113, %c0_44] : memref<1120x256xf32, #tpu.memory_space<vmem>>, vector<1x256xf32>
    %c7 = arith.constant 7 : index
    %c0_45 = arith.constant 0 : index
    %129 = vector.load %arg3[%c7, %c0_45] : memref<8x256xf32, #tpu.memory_space<vmem>>, vector<1x1xf32>
    %130 = vector.shape_cast %127 : vector<1x256xf32> to vector<1x1x1x256xf32>
    %131 = vector.broadcast %130 : vector<1x1x1x256xf32> to vector<1x16x8x256xf32>
    %132 = arith.mulf %125, %131 : vector<1x16x8x256xf32>
    %133 = vector.shape_cast %128 : vector<1x256xf32> to vector<1x1x1x256xf32>
    %134 = vector.broadcast %133 : vector<1x1x1x256xf32> to vector<1x16x8x256xf32>
    %135 = arith.mulf %126, %134 : vector<1x16x8x256xf32>
    %136 = arith.addf %132, %135 : vector<1x16x8x256xf32>
    %cst_46 = arith.constant dense<0.000000e+00> : vector<1x16x8xf32>
    %137 = vector.multi_reduction <add>, %136, %cst_46 [3] : vector<1x16x8x256xf32> to vector<1x16x8xf32>
    %138 = vector.shape_cast %129 : vector<1x1xf32> to vector<1x1x1xf32>
    %139 = vector.broadcast %138 : vector<1x1x1xf32> to vector<1x16x8xf32>
    %140 = arith.addf %137, %139 : vector<1x16x8xf32>
    %c0_47 = arith.constant 0 : index
    %c0_48 = arith.constant 0 : index
    %c0_49 = arith.constant 0 : index
    %141 = vector.load %arg5[%c0_47, %c0_48, %c0_49] : memref<1x16x8xf32, #tpu.memory_space<vmem>>, vector<1x16x8xf32>
    tpu.vector_store %arg5[%c0_47, %c0_48, %c0_49], %140 {strides = array<i32>} : memref<1x16x8xf32, #tpu.memory_space<vmem>>, vector<1x16x8xf32>,
    return
  }
  func.func @transform_0(%arg0: i32) -> (i32, i32, i32, i32) {
    %c0_i32 = arith.constant 0 : i32
    %c0_i32_0 = arith.constant 0 : i32
    %c0_i32_1 = arith.constant 0 : i32
    %c0_i32_2 = arith.constant 0 : i32
    return %arg0, %c0_i32, %c0_i32_0, %c0_i32_1 : i32, i32, i32, i32
  }
  func.func @transform_1(%arg0: i32) -> (i32, i32) {
    %c0_i32 = arith.constant 0 : i32
    %c0_i32_0 = arith.constant 0 : i32
    %c0_i32_1 = arith.constant 0 : i32
    return %c0_i32, %c0_i32_0 : i32, i32
  }
  func.func @transform_2(%arg0: i32) -> (i32, i32) {
    %c0_i32 = arith.constant 0 : i32
    %c0_i32_0 = arith.constant 0 : i32
    %c0_i32_1 = arith.constant 0 : i32
    return %c0_i32, %c0_i32_0 : i32, i32
  }
  func.func @transform_3(%arg0: i32) -> (i32, i32, i32) {
    %c0_i32 = arith.constant 0 : i32
    %c0_i32_0 = arith.constant 0 : i32
    %c0_i32_1 = arith.constant 0 : i32
    return %arg0, %c0_i32, %c0_i32_0 : i32, i32, i32
  }
  func.func @transform_4(%arg0: i32) -> (i32, i32, i32) {
    %c0_i32 = arith.constant 0 : i32
    %c0_i32_0 = arith.constant 0 : i32
    %c0_i32_1 = arith.constant 0 : i32
    return %arg0, %c0_i32, %c0_i32_0 : i32, i32, i32
  }
}

</mosaic_0001>

<bundles_post_ra>
// kernel: autoencoder_forward.1
= control target key start
LH: loop header
LB: loop body
LE: loop exit
PB: predicated region body
PF: predicated region fallthrough
CT: control target
= control target key end

     0   :  { %10 = vsyncpa [#allocation3], 0  ;;  %s4546_s0 = inlined_call_operand.vmem [shape: f32[2,16,8,1], index: 0, kind: input, shape index: {}]   ;;  %s4547_s1 = inlined_call_operand.hbm [shape: f32[1120,256], index: 1, kind: input, shape index: {}]   ;;  %s4548_s2 = inlined_call_operand.hbm [shape: f32[8,256], index: 2, kind: input, shape index: {}]   ;;  %s4549_s3 = inlined_call_operand.vmem [shape: f32[2,14,8], index: 3, kind: output, shape index: {0}]   ;;  %s4550_s4 = inlined_call_operand.vmem [shape: f32[2,16,8], index: 4, kind: output, shape index: {1}]  }
   0x1   :  { %11 = vsyncpa [#allocation5], 0  ;;  %s3466_s15 = smov 0  }
   0x2 LB: > { %s3472_s16 = sadd.s32 4294967295, %s3431_s15   ;;  %p2699_p0 = scmp.ge.s32.totalorder %s3431_s15, 1  ;;  %s3431_s15 = sphi %s3466_s15, %s17_s15  }
   0x3   : > { %p142_p1 = scmp.lt.s32.totalorder %s3431_s15, 3  ;;  %s3433_s17 = smov [#allocation2]  }
   0x4   : > { %s154_s18 = sshll.u32 %s3433_s17, 4  ;;  %p4551_p3 = scmp.eq.s32.totalorder %s3472_s16, 0  ;;  %s155_s18 = int_to_ptr.vmem [resolvable:$true] %s154_s18 }
   0x5   : > { %p3476_p2 = pnand %p2699_p0, %p142_p1  ;;  %s3434_s20 = smov [#allocation4]  }
   0x6   : > { %s168_s21 = sshll.u32 %s3434_s20, 4  ;;  %s3361_s25 = scalar_lea.hbm %s4547_s1, 35840  ;;  %s3489_s21 = int_to_ptr.vmem [resolvable:$true] %s168_s21 }
   0x7   : > { %s4553_s19 = scalar_select %p3476_p2, 1, 0 }
   0x8   : > { %p3331_p4 = pneg %p3476_p2  ;;  %p3362_p6 = scmp.ne.s32.totalorder %s4547_s1, %s3361_s25 }
   0x9   : > { %p3368_p10 = scmp.lt.u32.totalorder %s3361_s25, %s4547_s1 }
   0xa   : > { %p3485_p5 = pnand %p4551_p3, %p3331_p4 }
   0xc   : > { %p3363_p7 = pneg %p3485_p5 }
   0xe   : > { %p3364_p8 = pnand %p3363_p7, %p3362_p6 }
  0x10   : > { %p3365_p9 = pneg %p3364_p8 }
  0x12   : > { %p3370_p11 = pnand %p3368_p10, %p3365_p9 }
  0x14   : > { %3373 = shalt.err (!%p3370_p11)
}
  0x15   : > { %s3374_s30 = scalar_lea.vmem %s155_s18, 35840  ;;  %p3382_p1 = scmp.lt.s32.totalorder %s155_s18, %s155_s18 }
  0x16   : > { %p3375_p12 = scmp.ne.s32.totalorder %s155_s18, %s3374_s30  ;;  %p3383_p4 = scmp.lt.s32.totalorder %s3374_s30, %s3374_s30 }
  0x18   : > { %p3377_p13 = pnand %p3375_p12, %p3363_p7  ;;  %p3384_p3 = por %p3383_p4, %p3382_p1 }
  0x1a   : > { %p3378_p0 = pneg %p3377_p13 }
  0x1c   : > { %p3385_p2 = pnand %p3384_p3, %p3378_p0 }
  0x1e   : > { %3388 = shalt.err (!%p3385_p2)
}
  0x1f   : > { %s3435_s5 = smov 256   ;;  %s3436_s6 = smov 16  }
  0x20   : > { %3334 = dma.hbm_to_vmem [thread:$0]  (!%p3485_p5), %s4547_s1, 35840, %s155_s18, [#allocation3], %s3435_s5, %s3435_s5, %s3436_s6  }
  0x21   : > { %s3389_s11 = scalar_lea.hbm %s4548_s2, 256 }
  0x22   : > { %p3390_p6 = scmp.ne.s32.totalorder %s4548_s2, %s3389_s11  ;;  %p3396_p8 = scmp.lt.u32.totalorder %s3389_s11, %s4548_s2 }
  0x24   : > { %p3392_p2 = pnand %p3390_p6, %p3363_p7 }
  0x26   : > { %p3393_p3 = pneg %p3392_p2 }
  0x28   : > { %p3398_p9 = pnand %p3396_p8, %p3393_p3 }
  0x2a   : > { %3401 = shalt.err (!%p3398_p9)
}
  0x2b   : > { %s3402_s18 = scalar_lea.vmem %s3489_s21, 256  ;;  %p3410_p13 = scmp.lt.s32.totalorder %s3489_s21, %s3489_s21 }
  0x2c   : > { %p3403_p10 = scmp.ne.s32.totalorder %s3489_s21, %s3402_s18  ;;  %p3411_p0 = scmp.lt.s32.totalorder %s3402_s18, %s3402_s18 }
  0x2e   : > { %p3405_p11 = pnand %p3403_p10, %p3363_p7  ;;  %p3412_p1 = por %p3411_p0, %p3410_p13 }
  0x30   : > { %p3406_p12 = pneg %p3405_p11 }
  0x32   : > { %p3413_p4 = pnand %p3412_p1, %p3406_p12 }
  0x34   : > { %3416 = shalt.err (!%p3413_p4)
}
  0x35   : > { %3337 = dma.hbm_to_vmem [thread:$0]  (!%p3485_p5), %s4548_s2, 256, %s3489_s21, [#allocation5]  }
  0x36   : > { %p4555_p6 = scmp.ne.s32.totalorder %s4553_s19, 0 }
  0x37   : > { %p4556_p2 = scmp.eq.s32.totalorder (!%p4555_p6), %s3472_s16, 0 }
  0x38   : > { %189 = sbr.rel (%p4555_p6) target bundleno = 1720 (0x6b8), region = 32 }
  0x3f   : > { %3422 = dma.done.wait (%p4556_p2), [#allocation3], 35840   ;;  %p4557_p7 = pmov %p4556_p2 }
  0x40   : > { %p4558_p3 = pmov %p4556_p2 }
  0x41   : > { %3424 = vsyncadd (%p4557_p7), [#allocation3], 4294931456 }
  0x42   : > { %3426 = dma.done.wait (%p4558_p3), [#allocation5], 256   ;;  %p4559_p8 = pmov %p4556_p2 }
  0x43   : > { %p224_p9 = scmp.lt.s32.totalorder %s3472_s16, 1  ;;  %v346_v0 = vlaneseq  ;;  %v3437_v1 = vmov 0   ;;  %v562_v11 = vld [vmem:[#allocation2 + $0x310] sm:$0xff]  ;;  %v563_v12 = vld [vmem:[#allocation2 + $0x320] sm:$0xff]  ;;  %vm3439_vm0 = vmmov 0   ;;  %vm1226_vm1 = vcmask 261120  }
  0x44   : > { %3428 = vsyncadd (%p4559_p8), [#allocation5], 4294967040  ;;  %3359 = vset.pattern.permute.xlu1 %v3437_v1  ;;  %3358 = vset.pattern.permute.xlu0 %v3437_v1  ;;  %v635_v13 = vpack.c.bf16 %v563_v12, %v562_v11  ;;  %v530_v14 = vld [vmem:[#allocation2 + $0x110] sm:$0xff]  ;;  %v531_v15 = vld [vmem:[#allocation2 + $0x120] sm:$0xff]  ;;  %vm1374_vm2 = vcmask 1041409   ;;  %vm1376_vm3 = vcmask 1042434  }
  0x45   : > { %s4561_s16 = smov (!%p224_p9, %s3472_s16), 1  ;;  %v3554_v2 = vshrl.u32 %v346_v0, 7  ;;  %v1317_v3 = vand.u32 127, %v346_v0  ;;  %v546_v16 = vld [vmem:[#allocation2 + $0x210] sm:$0xff]  ;;  %v619_v17 = vpack.c.bf16 %v531_v15, %v530_v14  ;;  %v547_v18 = vld [vmem:[#allocation2 + $0x220] sm:$0xff]  ;;  %vm1378_vm4 = vcmask 1043459  }
  0x46   : > { %s2744_s19 = sshll.u32 %s4561_s16, 7  ;;  %v514_v19 = vld [vmem:[#allocation2 + $0x10] sm:$0xff]  ;;  %v515_v20 = vld [vmem:[#allocation2 + $0x20] sm:$0xff]  ;;  %2747 = vmatprep.subr.bf16.mxu0 %v635_v13  ;;  %v627_v23 = vpack.c.bf16 %v547_v18, %v546_v16  ;;  %vm1380_vm5 = vcmask 1044484   ;;  %vm1382_vm6 = vcmask 1045509   ;;  %vm1384_vm7 = vcmask 1046534  }
  0x47   : > { %v3558_v4 = vsub.s32 %v1317_v3, %v3554_v2  ;;  %s3563_s24 = scalar_lea.vmem %s4546_s0, %s2744_s19  ;;  %v611_v24 = vpack.c.bf16 %v515_v20, %v514_v19  ;;  %v564_v25 = vld [vmem:[#allocation2 + $0x330] sm:$0xff]  ;;  %v565_v26 = vld [vmem:[#allocation2 + $0x340] sm:$0xff]  ;;  %2811 = vmatprep.subr.bf16.mxu1 %v619_v17  ;;  %s2745_s25 = sshll.u32 %s4561_s16, 4  ;;  %vm1397_vm8 = vcmask 62464   ;;  %vm1386_vm9 = vcmask 1047559  }
  0x48   : > { %v242_v5 = vld [vmem:[%s3563_s24 + $0x10] sm:$0xff]  ;;  %v240_v6 = vld [vmem:[%s3563_s24] sm:$0xff]  ;;  %v243_v7 = vld [vmem:[%s3563_s24 + $0x18] sm:$0xff]  ;;  %v636_v28 = vpack.c.bf16 %v565_v26, %v564_v25  ;;  %2748 = vmatpush3.bf16.msra.mxu0 %v627_v23  ;;  %s233_s28 = scalar_lea.vmem %s4549_s3, %s2745_s25  ;;  %vm1395_vm10 = vcmask 64512   ;;  %s238_s5 = scalar_lea.vmem %s4550_s4, %s2745_s25 }
  0x49   : > { %277 = vperm.xlu1 %3359, %v242_v5   ;;  %267 = vperm.xlu0 %3358, %v240_v6   ;;  %v241_v8 = vld [vmem:[%s3563_s24 + $0x8] sm:$0xff]  ;;  %v244_v10 = vld [vmem:[%s3563_s24 + $0x20] sm:$0xff]  ;;  %v247_v21 = vld [vmem:[%s3563_s24 + $0x38] sm:$0xff] }
  0x4a   : > { %v245_v9 = vld [vmem:[%s3563_s24 + $0x28] sm:$0xff]  ;;  %v246_v22 = vld [vmem:[%s3563_s24 + $0x30] sm:$0xff]  ;;  %v533_v29 = vld [vmem:[#allocation2 + $0x140] sm:$0xff]  ;;  %2812 = vmatpush3.bf16.msra.mxu1 %v611_v24  ;;  %2749 = vmatprep.subr.bf16.mxu0 %v636_v28 }
  0x4b   : > { %v532_v27 = vld [vmem:[#allocation2 + $0x130] sm:$0xff]  ;;  %v549_v31 = vld [vmem:[#allocation2 + $0x240] sm:$0xff]  ;;  %v249_v41 = vld [vmem:[%s3563_s24 + $0x48] sm:$0xff] }
  0x4c   : > { %v548_v30 = vld [vmem:[#allocation2 + $0x230] sm:$0xff]  ;;  %v620_v32 = vpack.c.bf16 %v533_v29, %v532_v27  ;;  %v517_v35 = vld [vmem:[#allocation2 + $0x40] sm:$0xff]  ;;  %v251_v3 = vld [vmem:[%s3563_s24 + $0x58] sm:$0xff] }
  0x4d   : > { %282 = vperm.xlu1 %3359, %v243_v7   ;;  %272 = vperm.xlu0 %3358, %v241_v8   ;;  %v628_v33 = vpack.c.bf16 %v549_v31, %v548_v30  ;;  %v516_v34 = vld [vmem:[#allocation2 + $0x30] sm:$0xff]  ;;  %v567_v38 = vld [vmem:[#allocation2 + $0x360] sm:$0xff]  ;;  %v253_v18 = vld [vmem:[%s3563_s24 + $0x68] sm:$0xff] }
  0x4e   : > { %v566_v36 = vld [vmem:[#allocation2 + $0x350] sm:$0xff]  ;;  %v612_v37 = vpack.c.bf16 %v517_v35, %v516_v34  ;;  %v535_v40 = vld [vmem:[#allocation2 + $0x160] sm:$0xff]  ;;  %2813 = vmatprep.subr.bf16.mxu1 %v620_v32  ;;  %v255_v32 = vld [vmem:[%s3563_s24 + $0x78] sm:$0xff] }
  0x4f   : > { %v534_v39 = vld [vmem:[#allocation2 + $0x150] sm:$0xff]  ;;  %v637_v42 = vpack.c.bf16 %v567_v38, %v566_v36  ;;  %v551_v45 = vld [vmem:[#allocation2 + $0x260] sm:$0xff]  ;;  %2750 = vmatpush3.bf16.msra.mxu0 %v628_v33 }
  0x50   : > { %v621_v43 = vpack.c.bf16 %v535_v40, %v534_v39  ;;  %v550_v44 = vld [vmem:[#allocation2 + $0x250] sm:$0xff]  ;;  %v519_v47 = vld [vmem:[#allocation2 + $0x60] sm:$0xff]  ;;  %2814 = vmatpush3.bf16.msra.mxu1 %v612_v37 }
  0x51   : > { %292 = vperm.xlu1 %3359, %v245_v9   ;;  %287 = vperm.xlu0 %3358, %v244_v10   ;;  %v518_v46 = vld [vmem:[#allocation2 + $0x50] sm:$0xff]  ;;  %v569_v49 = vld [vmem:[#allocation2 + $0x380] sm:$0xff]  ;;  %v629_v51 = vpack.c.bf16 %v551_v45, %v550_v44 }
  0x52   : > { %v568_v48 = vld [vmem:[#allocation2 + $0x370] sm:$0xff]  ;;  %v248_v50 = vld [vmem:[%s3563_s24 + $0x40] sm:$0xff]  ;;  %2751 = vmatprep.subr.bf16.mxu0 %v637_v42  ;;  %v613_v54 = vpack.c.bf16 %v519_v47, %v518_v46  ;;  %2815 = vmatprep.subr.bf16.mxu1 %v621_v43 }
  0x53   : > { %v536_v52 = vld [vmem:[#allocation2 + $0x170] sm:$0xff]  ;;  %v537_v53 = vld [vmem:[#allocation2 + $0x180] sm:$0xff]  ;;  %v638_v55 = vpack.c.bf16 %v569_v49, %v568_v48  ;;  %2752 = vmatpush3.bf16.msra.mxu0 %v629_v51 }
  0x54   : > { %v552_v56 = vld [vmem:[#allocation2 + $0x270] sm:$0xff]  ;;  %v553_v57 = vld [vmem:[#allocation2 + $0x280] sm:$0xff]  ;;  %v622_v59 = vpack.c.bf16 %v537_v53, %v536_v52  ;;  %2816 = vmatpush3.bf16.msra.mxu1 %v613_v54 }
  0x55   : > { %302 = vperm.xlu1 %3359, %v247_v21   ;;  %297 = vperm.xlu0 %3358, %v246_v22   ;;  %v520_v58 = vld [vmem:[#allocation2 + $0x70] sm:$0xff]  ;;  %v521_v60 = vld [vmem:[#allocation2 + $0x80] sm:$0xff]  ;;  %v630_v6 = vpack.c.bf16 %v553_v57, %v552_v56  ;;  %v3438_v56 = vmov 0.0|0.0   ;;  %v3584_v57 = vsub.s32 0, %v3554_v2 }
  0x56   : > { %v570_v61 = vld [vmem:[#allocation2 + $0x390] sm:$0xff]  ;;  %v571_v62 = vld [vmem:[#allocation2 + $0x3a0] sm:$0xff]  ;;  %2753 = vmatprep.subr.bf16.mxu0 %v638_v55  ;;  %v614_v7 = vpack.c.bf16 %v521_v60, %v520_v58  ;;  %2817 = vmatprep.subr.bf16.mxu1 %v622_v59  ;;  %v3587_v58 = vsub.s32 1, %v3554_v2 }
  0x57   : > { %v538_v63 = vld [vmem:[#allocation2 + $0x190] sm:$0xff]  ;;  %v539_v0 = vld [vmem:[#allocation2 + $0x1a0] sm:$0xff]  ;;  %v639_v8 = vpack.c.bf16 %v571_v62, %v570_v61  ;;  %2754 = vmatpush3.bf16.msra.mxu0 %v630_v6 }
  0x58   : > { %v250_v5 = vld [vmem:[%s3563_s24 + $0x50] sm:$0xff]  ;;  %v555_v10 = vld [vmem:[#allocation2 + $0x2a0] sm:$0xff]  ;;  %v623_v12 = vpack.c.bf16 %v539_v0, %v538_v63  ;;  %2818 = vmatpush3.bf16.msra.mxu1 %v614_v7 }
  0x59   : > { %312 = vperm.xlu1 %3359, %v249_v41   ;;  %307 = vperm.xlu0 %3358, %v248_v50   ;;  %v554_v9 = vld [vmem:[#allocation2 + $0x290] sm:$0xff]  ;;  %v523_v13 = vld [vmem:[#allocation2 + $0xa0] sm:$0xff] }
  0x5a   : > { %v522_v11 = vld [vmem:[#allocation2 + $0x90] sm:$0xff]  ;;  %v573_v15 = vld [vmem:[#allocation2 + $0x3c0] sm:$0xff]  ;;  %v631_v20 = vpack.c.bf16 %v555_v10, %v554_v9  ;;  %2755 = vmatprep.subr.bf16.mxu0 %v639_v8  ;;  %2819 = vmatprep.subr.bf16.mxu1 %v623_v12 }
  0x5b   : > { %v572_v14 = vld [vmem:[#allocation2 + $0x3b0] sm:$0xff]  ;;  %v541_v17 = vld [vmem:[#allocation2 + $0x1c0] sm:$0xff]  ;;  %v615_v21 = vpack.c.bf16 %v523_v13, %v522_v11 }
  0x5c   : > { %v540_v16 = vld [vmem:[#allocation2 + $0x1b0] sm:$0xff]  ;;  %v252_v19 = vld [vmem:[%s3563_s24 + $0x60] sm:$0xff]  ;;  %v640_v22 = vpack.c.bf16 %v573_v15, %v572_v14  ;;  %2756 = vmatpush3.bf16.msra.mxu0 %v631_v20 }
  0x5d   : > { %322 = vperm.xlu1 %3359, %v251_v3   ;;  %317 = vperm.xlu0 %3358, %v250_v5   ;;  %v556_v23 = vld [vmem:[#allocation2 + $0x2b0] sm:$0xff]  ;;  %v557_v24 = vld [vmem:[#allocation2 + $0x2c0] sm:$0xff]  ;;  %v624_v26 = vpack.c.bf16 %v541_v17, %v540_v16 }
  0x5e   : > { %v524_v25 = vld [vmem:[#allocation2 + $0xb0] sm:$0xff]  ;;  %v525_v27 = vld [vmem:[#allocation2 + $0xc0] sm:$0xff]  ;;  %v632_v34 = vpack.c.bf16 %v557_v24, %v556_v23  ;;  %2820 = vmatpush3.bf16.msra.mxu1 %v615_v21  ;;  %2757 = vmatprep.subr.bf16.mxu0 %v640_v22 }
  0x5f   : > { %v574_v28 = vld [vmem:[#allocation2 + $0x3d0] sm:$0xff]  ;;  %v575_v29 = vld [vmem:[#allocation2 + $0x3e0] sm:$0xff]  ;;  %v616_v35 = vpack.c.bf16 %v525_v27, %v524_v25  ;;  %2821 = vmatprep.subr.bf16.mxu1 %v624_v26 }
  0x60   : > { %v542_v30 = vld [vmem:[#allocation2 + $0x1d0] sm:$0xff]  ;;  %v543_v31 = vld [vmem:[#allocation2 + $0x1e0] sm:$0xff]  ;;  %v641_v36 = vpack.c.bf16 %v575_v29, %v574_v28  ;;  %2758 = vmatpush3.bf16.msra.mxu0 %v632_v34 }
  0x61   : > { %332 = vperm.xlu1 %3359, %v253_v18   ;;  %327 = vperm.xlu0 %3358, %v252_v19   ;;  %v254_v33 = vld [vmem:[%s3563_s24 + $0x70] sm:$0xff]  ;;  %v559_v38 = vld [vmem:[#allocation2 + $0x2e0] sm:$0xff]  ;;  %v625_v40 = vpack.c.bf16 %v543_v31, %v542_v30 }
  0x62   : > { %v558_v37 = vld [vmem:[#allocation2 + $0x2d0] sm:$0xff]  ;;  %v527_v41 = vld [vmem:[#allocation2 + $0xe0] sm:$0xff]  ;;  %2822 = vmatpush3.bf16.msra.mxu1 %v616_v35  ;;  %2759 = vmatprep.subr.bf16.mxu0 %v641_v36 }
  0x63   : > { %v526_v39 = vld [vmem:[#allocation2 + $0xd0] sm:$0xff]  ;;  %v577_v43 = vld [vmem:[#allocation2 + $0x400] sm:$0xff]  ;;  %v633_v46 = vpack.c.bf16 %v559_v38, %v558_v37  ;;  %2823 = vmatprep.subr.bf16.mxu1 %v625_v40 }
  0x64   : > { %v576_v42 = vld [vmem:[#allocation2 + $0x3f0] sm:$0xff]  ;;  %v545_v45 = vld [vmem:[#allocation2 + $0x200] sm:$0xff]  ;;  %v617_v47 = vpack.c.bf16 %v527_v41, %v526_v39 }
  0x65   : > { %342 = vperm.xlu1 %3359, %v255_v32   ;;  %337 = vperm.xlu0 %3358, %v254_v33   ;;  %v544_v44 = vld [vmem:[#allocation2 + $0x1f0] sm:$0xff]  ;;  %v642_v48 = vpack.c.bf16 %v577_v43, %v576_v42  ;;  %v561_v50 = vld [vmem:[#allocation2 + $0x300] sm:$0xff] }
  0x66   : > { %v560_v49 = vld [vmem:[#allocation2 + $0x2f0] sm:$0xff]  ;;  %v626_v51 = vpack.c.bf16 %v545_v45, %v544_v44  ;;  %v529_v53 = vld [vmem:[#allocation2 + $0x100] sm:$0xff]  ;;  %2760 = vmatpush3.bf16.msra.mxu0 %v633_v46  ;;  %2824 = vmatpush3.bf16.msra.mxu1 %v617_v47 }
  0x67   : > { %v528_v52 = vld [vmem:[#allocation2 + $0xf0] sm:$0xff]  ;;  %v634_v54 = vpack.c.bf16 %v561_v50, %v560_v49  ;;  %2761 = vmatprep.subr.bf16.mxu0 %v642_v48  ;;  %v256_v59 = vld [vmem:[#allocation2] ss:$8 sm:$0x3] }
  0x68   : > { %v618_v55 = vpack.c.bf16 %v529_v53, %v528_v52  ;;  %2825 = vmatprep.subr.bf16.mxu1 %v626_v51  ;;  %v258_v60 = vld [vmem:[#allocation2 + $0x1] ss:$8 sm:$0x3]  ;;  %v3590_v61 = vrot.slane %v256_v59, %v3584_v57  ;;  %v3593_v62 = vrot.slane %v256_v59, %v3587_v58  ;;  %v259_v9 = vld [vmem:[#allocation4] ss:$8 sm:$0x3] }
  0x69   : > { %v3596_v3 = vrot.slane %v258_v60, %v3584_v57  ;;  %v3599_v5 = vrot.slane %v258_v60, %v3587_v58  ;;  %v3614_v20 = vrot.slane %v259_v9, %v3584_v57  ;;  %v3617_v21 = vrot.slane %v259_v9, %v3587_v58  ;;  %v869_v22 = vld [vmem:[#allocation2 + $0x510] sm:$0xff]  ;;  %v870_v23 = vld [vmem:[#allocation2 + $0x520] sm:$0xff] }
  0x6a   : > { %2762 = vmatpush3.bf16.msra.mxu0 %v634_v54  ;;  %2826 = vmatpush3.bf16.msra.mxu1 %v618_v55  ;;  %v356_v7 = vmul.f32 0.0, %v3590_v61  ;;  %v357_v10 = vmul.f32 0.0, %v3593_v62  ;;  %v3196_v33 = vpack.c.bf16 %v870_v23, %v869_v22  ;;  %v853_v34 = vld [vmem:[#allocation2 + $0x410] sm:$0xff]  ;;  %v854_v35 = vld [vmem:[#allocation2 + $0x420] sm:$0xff] }
  0x6b   : > { %3195 = vmatprep.subr.bf16.mxu0 %v3438_v56  ;;  %3219 = vmatprep.subr.bf16.mxu1 %v3438_v56  ;;  %v3220_v49 = vpack.c.bf16 %v854_v35, %v853_v34  ;;  %v871_v9 = vld [vmem:[#allocation2 + $0x530] sm:$0xff]  ;;  %v874_v35 = vld [vmem:[#allocation2 + $0x560] sm:$0xff] }
  0x6c   : > { %v873_v34 = vld [vmem:[#allocation2 + $0x550] sm:$0xff] }
  0xc8   : > { %v278_v63 = vpop.permute.xlu1 %277  ;;  %v268_v0 = vpop.permute.xlu0 %267 }
  0xc9   : > { %v405_v6 = vmul.f32 %v3596_v3, %v278_v63  ;;  %v406_v2 = vmul.f32 %v3599_v5, %v278_v63  ;;  %v358_v11 = vmul.f32 %v3590_v61, %v268_v0  ;;  %v359_v12 = vmul.f32 %v3593_v62, %v268_v0 }
  0xca   : > { %v401_v13 = vmul.f32 %v3596_v3, %v268_v0  ;;  %v402_v14 = vmul.f32 %v3599_v5, %v268_v0  ;;  %v363_v29 = vmul.f32 %v3593_v62, %v278_v63  ;;  %v362_v41 = vmul.f32 %v3590_v61, %v278_v63 }
  0xcc   : > { %v273_v8 = vpop.permute.xlu0 %272  ;;  %v283_v15 = vpop.permute.xlu1 %282  ;;  %v435_v30 = vadd.f32 %v401_v13, %v356_v7  ;;  %v436_v32 = vadd.f32 %v402_v14, %v357_v10  ;;  %v872_v10 = vld [vmem:[#allocation2 + $0x540] sm:$0xff] }
  0xcd   : > { %v360_v16 = vmul.f32 %v3590_v61, %v273_v8  ;;  %v361_v17 = vmul.f32 %v3593_v62, %v273_v8  ;;  %v403_v18 = vmul.f32 %v3596_v3, %v273_v8  ;;  %v404_v19 = vmul.f32 %v3599_v5, %v273_v8 }
  0xce   : > { %v408_v31 = vmul.f32 %v3599_v5, %v283_v15  ;;  %v407_v42 = vmul.f32 %v3596_v3, %v283_v15  ;;  %v481_v47 = vadd.f32 %v3617_v21, %v436_v32  ;;  %v480_v48 = vadd.f32 %v3614_v20, %v435_v30 }
  0xcf   : > { %v437_v24 = vadd.f32 %v403_v18, %v358_v11  ;;  %v439_v25 = vadd.f32 %v405_v6, %v360_v16  ;;  %v438_v27 = vadd.f32 %v404_v19, %v359_v12  ;;  %v440_v28 = vadd.f32 %v406_v2, %v361_v17  ;;  %v855_v17 = vld [vmem:[#allocation2 + $0x430] sm:$0xff]  ;;  %v856_v18 = vld [vmem:[#allocation2 + $0x440] sm:$0xff] }
  0xd0   : > { %v288_v26 = vpop.permute.xlu0 %287  ;;  %v3621_v36 = vpop.permute.xlu1 %292  ;;  %v442_v45 = vadd.f32 %v408_v31, %v363_v29  ;;  %v364_v50 = vmul.f32 %v3590_v61, %v283_v15  ;;  %v365_v51 = vmul.f32 %v3593_v62, %v283_v15  ;;  %v441_v63 = vadd.f32 %v407_v42, %v362_v41  ;;  %v858_v41 = vld [vmem:[#allocation2 + $0x460] sm:$0xff] }
  0xd1   : > { %v483_v37 = vadd.f32 %v3617_v21, %v438_v27  ;;  %v485_v38 = vadd.f32 %v3617_v21, %v440_v28  ;;  %v482_v39 = vadd.f32 %v3614_v20, %v437_v24  ;;  %v3627_v40 = vadd.f32 %v3614_v20, %v439_v25 }
  0xd2   : > { %v409_v43 = vmul.f32 %v3596_v3, %v288_v26  ;;  %v410_v44 = vmul.f32 %v3599_v5, %v288_v26  ;;  %v412_v52 = vmul.f32 %v3599_v5, %v3621_v36  ;;  %v367_v53 = vmul.f32 %v3593_v62, %v288_v26 }
  0xd3   : > { %v596_v54 = vpack.c.bf16 %v485_v38, %v483_v37  ;;  %v580_v55 = vpack.c.bf16 %v483_v37, %v481_v47  ;;  %v595_v59 = vpack.c.bf16 %v3627_v40, %v482_v39  ;;  %v579_v60 = vpack.c.bf16 %v482_v39, %v480_v48  ;;  %v857_v39 = vld [vmem:[#allocation2 + $0x450] sm:$0xff] }
  0xd4   : > { %v3633_v46 = vpop.permute.xlu0 %297  ;;  %v443_v0 = vadd.f32 %v409_v43, %v364_v50  ;;  %v444_v6 = vadd.f32 %v410_v44, %v365_v51  ;;  %v487_v7 = vadd.f32 %v3617_v21, %v442_v45  ;;  %v369_v8 = vmul.f32 %v3593_v62, %v3621_v36  ;;  %v303_v22 = vpop.permute.xlu1 %302 }
  0xd5   : > { %v414_v2 = vmul.f32 %v3599_v5, %v3633_v46  ;;  %675 = vmatprep.mubr.bf16.mxu0 %v596_v54  ;;  %772 = vmatprep.mubr.bf16.mxu1 %v580_v55  ;;  %v446_v11 = vadd.f32 %v412_v52, %v367_v53  ;;  %v486_v15 = vadd.f32 %v3614_v20, %v441_v63  ;;  %v875_v52 = vld [vmem:[#allocation2 + $0x570] sm:$0xff] }
  0xd6   : > { %676 = vmatmul.mubr.bf16.vlgmr.msra.gmra.mrb[0].mxu0 %v595_v59  ;;  %773 = vmatmul.mubr.bf16.vlgmr.msra.gmra.mrb[0].mxu1 %v579_v60  ;;  %v582_v12 = vpack.c.bf16 %v487_v7, %v485_v38  ;;  %v489_v14 = vadd.f32 %v3617_v21, %v444_v6  ;;  %v3651_v16 = vadd.f32 %v3614_v20, %v443_v0  ;;  %v859_v63 = vld [vmem:[#allocation2 + $0x470] sm:$0xff]  ;;  %v860_v0 = vld [vmem:[#allocation2 + $0x480] sm:$0xff] }
  0xd7   : > { %3197 = vmatpush3.bf16.msra.mxu0 %v3196_v33  ;;  %v448_v13 = vadd.f32 %v414_v2, %v369_v8  ;;  %3221 = vmatpush3.bf16.msra.mxu1 %v3220_v49  ;;  %v3199_v19 = vpack.c.bf16 %v872_v10, %v871_v9  ;;  %v411_v25 = vmul.f32 %v3596_v3, %v3621_v36 }
  0xd8   : > { %780 = vmatprep.mubr.bf16.mxu1 %v582_v12  ;;  %v3653_v23 = vpop.permute.xlu0 %307  ;;  %v598_v24 = vpack.c.bf16 %v489_v14, %v487_v7  ;;  %3198 = vmatprep.subr.bf16.mxu0 %v3438_v56  ;;  %v366_v27 = vmul.f32 %v3590_v61, %v288_v26  ;;  %v413_v28 = vmul.f32 %v3596_v3, %v3633_v46  ;;  %v3677_v49 = vpop.permute.xlu1 %312 }
  0xd9   : > { %3222 = vmatprep.subr.bf16.mxu1 %v3438_v56  ;;  %v3223_v29 = vpack.c.bf16 %v856_v18, %v855_v17  ;;  %v597_v30 = vpack.c.bf16 %v3651_v16, %v486_v15  ;;  %v581_v31 = vpack.c.bf16 %v486_v15, %v3627_v40  ;;  %v491_v32 = vadd.f32 %v3617_v21, %v446_v11  ;;  %v877_v15 = vld [vmem:[#allocation2 + $0x590] sm:$0xff]  ;;  %v878_v17 = vld [vmem:[#allocation2 + $0x5a0] sm:$0xff] }
  0xda   : > { %683 = vmatprep.mubr.bf16.mxu0 %v598_v24  ;;  %v3666_v33 = vadd.f32 %v3617_v21, %v448_v13  ;;  %v416_v26 = vmul.f32 %v3599_v5, %v303_v22  ;;  %v371_v37 = vmul.f32 %v3593_v62, %v3633_v46  ;;  %v418_v38 = vmul.f32 %v3599_v5, %v3653_v23 }
  0xdb   : > { %3200 = vmatpush3.bf16.msra.mxu0 %v3199_v19  ;;  %v368_v40 = vmul.f32 %v3590_v61, %v3621_v36  ;;  %v584_v43 = vpack.c.bf16 %v491_v32, %v489_v14  ;;  %v373_v44 = vmul.f32 %v3593_v62, %v303_v22  ;;  %3224 = vmatpush3.bf16.msra.mxu1 %v3223_v29  ;;  %v876_v36 = vld [vmem:[#allocation2 + $0x580] sm:$0xff] }
  0xdc   : > { %v600_v42 = vpack.c.bf16 %v3666_v33, %v491_v32  ;;  %v3202_v45 = vpack.c.bf16 %v874_v35, %v873_v34  ;;  %v445_v47 = vadd.f32 %v411_v25, %v366_v27  ;;  %v3679_v50 = vpop.permute.xlu0 %317  ;;  %v3226_v51 = vpack.c.bf16 %v858_v41, %v857_v39  ;;  %3201 = vmatprep.subr.bf16.mxu0 %v3438_v56  ;;  %v861_v25 = vld [vmem:[#allocation2 + $0x490] sm:$0xff]  ;;  %v862_v27 = vld [vmem:[#allocation2 + $0x4a0] sm:$0xff]  ;;  %v3709_v29 = vpop.permute.xlu1 %322 }
  0xdd   : > { %v447_v48 = vadd.f32 %v413_v28, %v368_v40  ;;  %v450_v53 = vadd.f32 %v416_v26, %v371_v37  ;;  %v452_v54 = vadd.f32 %v418_v38, %v373_v44  ;;  %v415_v55 = vmul.f32 %v3596_v3, %v303_v22  ;;  %3225 = vmatprep.subr.bf16.mxu1 %v3438_v56  ;;  %v879_v38 = vld [vmem:[#allocation2 + $0x5b0] sm:$0xff]  ;;  %v864_v44 = vld [vmem:[#allocation2 + $0x4c0] sm:$0xff] }
  0xde   : > { %684 = vmatmul.mubr.bf16.gmra.mrb[4].mxu0 %v597_v30  ;;  %781 = vmatmul.mubr.bf16.gmra.mrb[4].mxu1 %v581_v31  ;;  %v370_v59 = vmul.f32 %v3590_v61, %v3633_v46  ;;  %v417_v60 = vmul.f32 %v3596_v3, %v3653_v23  ;;  %v420_v6 = vmul.f32 %v3599_v5, %v3677_v49 }
  0xdf   : > { %691 = vmatprep.mubr.bf16.mxu0 %v600_v42  ;;  %788 = vmatprep.mubr.bf16.mxu1 %v584_v43  ;;  %v375_v2 = vmul.f32 %v3593_v62, %v3653_v23  ;;  %v422_v7 = vmul.f32 %v3599_v5, %v3679_v50  ;;  %v3205_v8 = vpack.c.bf16 %v876_v36, %v875_v52  ;;  %v880_v42 = vld [vmem:[#allocation2 + $0x5c0] sm:$0xff]  ;;  %v863_v43 = vld [vmem:[#allocation2 + $0x4b0] sm:$0xff] }
  0xe0   : > { %3203 = vmatpush3.bf16.msra.mxu0 %v3202_v45  ;;  %v372_v46 = vmul.f32 %v3590_v61, %v303_v22  ;;  %v490_v9 = vadd.f32 %v3614_v20, %v445_v47  ;;  %v3697_v10 = vadd.f32 %v3614_v20, %v447_v48  ;;  %3227 = vmatpush3.bf16.msra.mxu1 %v3226_v51  ;;  %v3713_v34 = vpop.permute.xlu0 %327  ;;  %v881_v52 = vld [vmem:[#allocation2 + $0x5d0] sm:$0xff] }
  0xe1   : > { %v377_v11 = vmul.f32 %v3593_v62, %v3677_v49  ;;  %v495_v12 = vadd.f32 %v3617_v21, %v450_v53  ;;  %v3703_v13 = vadd.f32 %v3617_v21, %v452_v54  ;;  %3204 = vmatprep.subr.bf16.mxu0 %v3438_v56  ;;  %v3229_v14 = vpack.c.bf16 %v860_v0, %v859_v63 }
  0xe2   : > { %v449_v18 = vadd.f32 %v415_v55, %v370_v59  ;;  %v451_v19 = vadd.f32 %v417_v60, %v372_v46  ;;  %v599_v22 = vpack.c.bf16 %v3697_v10, %v490_v9  ;;  %v583_v24 = vpack.c.bf16 %v490_v9, %v3651_v16  ;;  %3228 = vmatprep.subr.bf16.mxu1 %v3438_v56  ;;  %v882_v55 = vld [vmem:[#allocation2 + $0x5e0] sm:$0xff]  ;;  %v865_v59 = vld [vmem:[#allocation2 + $0x4d0] sm:$0xff] }
  0xe3   : > { %v454_v28 = vadd.f32 %v420_v6, %v375_v2  ;;  %v456_v30 = vadd.f32 %v422_v7, %v377_v11  ;;  %v602_v31 = vpack.c.bf16 %v3703_v13, %v495_v12  ;;  %v586_v32 = vpack.c.bf16 %v495_v12, %v3666_v33  ;;  %v866_v60 = vld [vmem:[#allocation2 + $0x4e0] sm:$0xff]  ;;  %v333_v6 = vpop.permute.xlu1 %332 }
  0xe4   : > { %3206 = vmatpush3.bf16.msra.mxu0 %v3205_v8  ;;  %v3208_v35 = vpack.c.bf16 %v878_v17, %v877_v15  ;;  %v419_v16 = vmul.f32 %v3596_v3, %v3677_v49  ;;  %v374_v26 = vmul.f32 %v3590_v61, %v3653_v23  ;;  %v3232_v37 = vpack.c.bf16 %v862_v27, %v861_v25  ;;  %v3748_v12 = vpop.permute.xlu0 %337 }
  0xe5   : > { %v424_v39 = vmul.f32 %v3599_v5, %v3709_v29  ;;  %v421_v33 = vmul.f32 %v3596_v3, %v3679_v50  ;;  %v494_v41 = vadd.f32 %v3614_v20, %v449_v18  ;;  %v3725_v40 = vadd.f32 %v3614_v20, %v451_v19  ;;  %3230 = vmatpush3.bf16.msra.mxu1 %v3229_v14 }
  0xe6   : > { %692 = vmatmul.mubr.bf16.gmra.mrb[8].mxu0 %v599_v22  ;;  %789 = vmatmul.mubr.bf16.gmra.mrb[8].mxu1 %v583_v24  ;;  %v379_v23 = vmul.f32 %v3593_v62, %v3679_v50  ;;  %v426_v45 = vmul.f32 %v3599_v5, %v3713_v34  ;;  %v499_v47 = vadd.f32 %v3617_v21, %v454_v28 }
  0xe7   : > { %699 = vmatprep.mubr.bf16.mxu0 %v602_v31  ;;  %796 = vmatprep.mubr.bf16.mxu1 %v586_v32  ;;  %v3733_v48 = vadd.f32 %v3617_v21, %v456_v30  ;;  %v376_v51 = vmul.f32 %v3590_v61, %v3677_v49  ;;  %v381_v36 = vmul.f32 %v3593_v62, %v3709_v29 }
  0xe8   : > { %3207 = vmatprep.subr.bf16.mxu0 %v3438_v56  ;;  %3231 = vmatprep.subr.bf16.mxu1 %v3438_v56  ;;  %v3211_v53 = vpack.c.bf16 %v880_v42, %v879_v38  ;;  %v3235_v54 = vpack.c.bf16 %v864_v44, %v863_v43  ;;  %v453_v63 = vadd.f32 %v419_v16, %v374_v26  ;;  %v343_v26 = vpop.permute.xlu1 %342 }
  0xe9   : > { %3209 = vmatpush3.bf16.msra.mxu0 %v3208_v35  ;;  %v455_v0 = vadd.f32 %v421_v33, %v376_v51  ;;  %v601_v2 = vpack.c.bf16 %v3725_v40, %v494_v41  ;;  %v585_v7 = vpack.c.bf16 %v494_v41, %v3697_v10  ;;  %3233 = vmatpush3.bf16.msra.mxu1 %v3232_v37  ;;  %v434_v41 = vmul.f32 0.0, %v3599_v5 }
  0xea   : > { %v458_v49 = vadd.f32 %v424_v39, %v379_v23  ;;  %v460_v8 = vadd.f32 %v426_v45, %v381_v36  ;;  %v604_v46 = vpack.c.bf16 %v3733_v48, %v499_v47  ;;  %v588_v9 = vpack.c.bf16 %v499_v47, %v3703_v13  ;;  %3210 = vmatprep.subr.bf16.mxu0 %v3438_v56 }
  0xeb   : > { %v423_v11 = vmul.f32 %v3596_v3, %v3709_v29  ;;  %v3214_v14 = vpack.c.bf16 %v882_v55, %v881_v52  ;;  %v3238_v15 = vpack.c.bf16 %v866_v60, %v865_v59  ;;  %v378_v10 = vmul.f32 %v3590_v61, %v3679_v50  ;;  %3234 = vmatprep.subr.bf16.mxu1 %v3438_v56 }
  0xec   : > { %v428_v17 = vmul.f32 %v3599_v5, %v333_v6  ;;  %v383_v18 = vmul.f32 %v3593_v62, %v3713_v34  ;;  %v425_v13 = vmul.f32 %v3596_v3, %v3713_v34  ;;  %v498_v19 = vadd.f32 %v3614_v20, %v453_v63 }
  0xed   : > { %v500_v22 = vadd.f32 %v3614_v20, %v455_v0  ;;  %3212 = vmatpush3.bf16.msra.mxu0 %v3211_v53  ;;  %v430_v50 = vmul.f32 %v3599_v5, %v3748_v12  ;;  %v503_v24 = vadd.f32 %v3617_v21, %v458_v49  ;;  %v505_v25 = vadd.f32 %v3617_v21, %v460_v8 }
  0xee   : > { %700 = vmatmul.mubr.bf16.gmra.mrb[12].mxu0 %v601_v2  ;;  %797 = vmatmul.mubr.bf16.gmra.mrb[12].mxu1 %v585_v7  ;;  %v380_v27 = vmul.f32 %v3590_v61, %v3709_v29  ;;  %v457_v28 = vadd.f32 %v423_v11, %v378_v10  ;;  %v385_v30 = vmul.f32 %v3593_v62, %v333_v6 }
  0xef   : > { %707 = vmatprep.mubr.bf16.mxu0 %v604_v46  ;;  %804 = vmatprep.mubr.bf16.mxu1 %v588_v9  ;;  %v462_v32 = vadd.f32 %v428_v17, %v383_v18  ;;  %v603_v35 = vpack.c.bf16 %v500_v22, %v498_v19  ;;  %v587_v16 = vpack.c.bf16 %v498_v19, %v3725_v40  ;;  %v883_v17 = vld [vmem:[#allocation2 + $0x5f0] sm:$0xff]  ;;  %v868_v19 = vld [vmem:[#allocation2 + $0x500] sm:$0xff] }
  0xf0   : > { %3236 = vmatpush3.bf16.msra.mxu1 %v3235_v54  ;;  %3213 = vmatprep.subr.bf16.mxu0 %v3438_v56  ;;  %v459_v31 = vadd.f32 %v425_v13, %v380_v27  ;;  %v464_v37 = vadd.f32 %v430_v50, %v385_v30  ;;  %v606_v38 = vpack.c.bf16 %v505_v25, %v503_v24  ;;  %v867_v18 = vld [vmem:[#allocation2 + $0x4f0] sm:$0xff] }
  0xf1   : > { %3237 = vmatprep.subr.bf16.mxu1 %v3438_v56  ;;  %3215 = vmatpush3.bf16.msra.mxu0 %v3214_v14  ;;  %v590_v39 = vpack.c.bf16 %v503_v24, %v3733_v48  ;;  %v427_v29 = vmul.f32 %v3596_v3, %v333_v6  ;;  %v382_v33 = vmul.f32 %v3590_v61, %v3713_v34 }
  0xf2   : > { %3216 = vmatprep.subr.bf16.mxu0 %v3438_v56  ;;  %v389_v40 = vmul.f32 %v3593_v62, %v343_v26  ;;  %v429_v42 = vmul.f32 %v3596_v3, %v3748_v12  ;;  %v502_v43 = vadd.f32 %v3614_v20, %v457_v28  ;;  %v504_v44 = vadd.f32 %v3614_v20, %v459_v31 }
  0xf3   : > { %v432_v23 = vmul.f32 %v3599_v5, %v343_v26  ;;  %v387_v34 = vmul.f32 %v3593_v62, %v3748_v12  ;;  %v507_v45 = vadd.f32 %v3617_v21, %v462_v32  ;;  %v509_v47 = vadd.f32 %v3617_v21, %v464_v37 }
  0xf4   : > { %3239 = vmatpush3.bf16.msra.mxu1 %v3238_v15  ;;  %v384_v48 = vmul.f32 %v3590_v61, %v333_v6  ;;  %v461_v51 = vadd.f32 %v427_v29, %v382_v33  ;;  %v605_v36 = vpack.c.bf16 %v504_v44, %v502_v43  ;;  %v589_v53 = vpack.c.bf16 %v502_v43, %v500_v22 }
  0xf5   : > { %3240 = vmatprep.subr.bf16.mxu1 %v3438_v56  ;;  %v468_v54 = vadd.f32 %v434_v41, %v389_v40  ;;  %v466_v55 = vadd.f32 %v432_v23, %v387_v34  ;;  %v608_v59 = vpack.c.bf16 %v509_v47, %v507_v45  ;;  %v592_v60 = vpack.c.bf16 %v507_v45, %v505_v25 }
  0xf6   : > { %708 = vmatmul.mubr.bf16.gmra.mrb[16].mxu0 %v603_v35  ;;  %805 = vmatmul.mubr.bf16.gmra.mrb[16].mxu1 %v587_v16  ;;  %v463_v52 = vadd.f32 %v429_v42, %v384_v48  ;;  %v433_v5 = vmul.f32 0.0, %v3596_v3  ;;  %v388_v62 = vmul.f32 %v3590_v61, %v343_v26  ;;  %v431_v63 = vmul.f32 %v3596_v3, %v343_v26  ;;  %v3803_v35 = vld [vmem:[#allocation4 + $0x1] ss:$0 sm:$0xff] }
  0xf7   : > { %715 = vmatprep.mubr.bf16.mxu0 %v606_v38  ;;  %812 = vmatprep.mubr.bf16.mxu1 %v590_v39  ;;  %v386_v0 = vmul.f32 %v3590_v61, %v3748_v12  ;;  %v506_v6 = vadd.f32 %v3614_v20, %v461_v51  ;;  %v511_v7 = vadd.f32 %v3617_v21, %v466_v55  ;;  %v3440_v22 = vmov 0.0  }
  0xf8   : > { %v508_v2 = vadd.f32 %v3614_v20, %v463_v52  ;;  %v513_v49 = vadd.f32 %v3617_v21, %v468_v54  ;;  %v467_v8 = vadd.f32 %v433_v5, %v388_v62  ;;  %v884_v21 = vld [vmem:[#allocation2 + $0x600] sm:$0xff]  ;;  %v3241_v50 = vpack.c.bf16 %v868_v19, %v867_v18 }
  0xf9   : > { %v465_v46 = vadd.f32 %v431_v63, %v386_v0  ;;  %v591_v11 = vpack.c.bf16 %v506_v6, %v504_v44  ;;  %v594_v15 = vpack.c.bf16 %v511_v7, %v509_v47  ;;  %v3217_v13 = vpack.c.bf16 %v884_v21, %v883_v17 }
  0xfa   : > { %v607_v9 = vpack.c.bf16 %v508_v2, %v506_v6  ;;  %v610_v14 = vpack.c.bf16 %v513_v49, %v511_v7  ;;  %v512_v3 = vadd.f32 %v3614_v20, %v467_v8  ;;  %3242 = vmatpush3.bf16.msra.mxu1 %v3241_v50 }
  0xfb   : > { %v510_v61 = vadd.f32 %v3614_v20, %v465_v46  ;;  %3218 = vmatpush3.bf16.msra.mxu0 %v3217_v13 }
  0xfd   : > { %v609_v12 = vpack.c.bf16 %v512_v3, %v510_v61  ;;  %v593_v10 = vpack.c.bf16 %v510_v61, %v508_v2 }
  0xfe   : > { %716 = vmatmul.mubr.bf16.gmra.mrb[20].mxu0 %v605_v36  ;;  %813 = vmatmul.mubr.bf16.gmra.mrb[20].mxu1 %v589_v53 }
  0xff   : > { %723 = vmatprep.mubr.bf16.mxu0 %v608_v59  ;;  %820 = vmatprep.mubr.bf16.mxu1 %v592_v60 }
 0x106   : > { %724 = vmatmul.mubr.bf16.gmra.mrb[24].mxu0 %v607_v9  ;;  %821 = vmatmul.mubr.bf16.gmra.mrb[24].mxu1 %v591_v11 }
 0x107   : > { %731 = vmatprep.mubr.bf16.mxu0 %v610_v14  ;;  %828 = vmatprep.mubr.bf16.mxu1 %v594_v15 }
 0x10e   : > { %732 = vmatmul.mubr.bf16.gmra.mrb[28].mxu0 %v609_v12  ;;  %829 = vmatmul.mubr.bf16.gmra.mrb[28].mxu1 %v593_v10 }
 0x10f   : > { %3086 = vmatprep.mubr.msk.f32.mxu1 %vm3439_vm0, %v3440_v22  ;;  %3009 = vmatprep.mubr.msk.f32.mxu0 %vm3439_vm0, %v3440_v22 }
 0x1a9   : > { %v2763_v20 = vpop.f32.mrb[0].mxu0  ;;  %v2827_v24 = vpop.f32.mrb[0].mxu1 }
 0x1aa   : > { %v2764_v25 = vpop.f32.mrb[1].mxu0  ;;  %v2828_v27 = vpop.f32.mrb[1].mxu1 }
 0x1ab   : > { %v2765_v28 = vadd.f32 %v2764_v25, %v2763_v20  ;;  %v2829_v30 = vadd.f32 %v2828_v27, %v2827_v24  ;;  %v2766_v31 = vpop.f32.mrb[2].mxu0  ;;  %v2830_v32 = vpop.f32.mrb[2].mxu1 }
 0x1ac   : > { %v2767_v16 = vpop.f32.mrb[3].mxu0  ;;  %v2831_v26 = vpop.f32.mrb[3].mxu1 }
 0x1ad   : > { %v775_v37 = vadd.f32 %v2829_v30, %v2765_v28  ;;  %v2768_v38 = vadd.f32 %v2767_v16, %v2766_v31  ;;  %v2832_v39 = vadd.f32 %v2831_v26, %v2830_v32 }
 0x1af   : > { %v837_v29 = vadd.f32 %v775_v37, %v3803_v35  ;;  %v778_v33 = vadd.f32 %v2832_v39, %v2768_v38 }
 0x1b1   : > { %v838_v41 = vadd.f32 %v778_v33, %v3803_v35  ;;  %v2769_v40 = vpop.f32.mrb[4].mxu0  ;;  %v2833_v42 = vpop.f32.mrb[4].mxu1  ;;  %3087 = vmatmul.mubr.f32.vlgmr.msra.gmra.mrb[32].mxu1 %v837_v29 }
 0x1b2   : > { %v2770_v43 = vpop.f32.mrb[5].mxu0  ;;  %v2834_v44 = vpop.f32.mrb[5].mxu1  ;;  %3089 = vmatprep.mubr.msk.f32.mxu1 %vm3439_vm0, %v3440_v22 }
 0x1b3   : > { %v2771_v23 = vadd.f32 %v2770_v43, %v2769_v40  ;;  %v2835_v34 = vadd.f32 %v2834_v44, %v2833_v42  ;;  %v2772_v45 = vpop.f32.mrb[6].mxu0  ;;  %v2836_v47 = vpop.f32.mrb[6].mxu1  ;;  %3010 = vmatmul.mubr.f32.vlgmr.msra.gmra.mrb[32].mxu0 %v838_v41 }
 0x1b4   : > { %v2773_v48 = vpop.f32.mrb[7].mxu0  ;;  %v2837_v51 = vpop.f32.mrb[7].mxu1  ;;  %3012 = vmatprep.mubr.msk.f32.mxu0 %vm3439_vm0, %v3440_v22 }
 0x1b5   : > { %v783_v52 = vadd.f32 %v2835_v34, %v2771_v23  ;;  %v2774_v36 = vadd.f32 %v2773_v48, %v2772_v45  ;;  %v2838_v53 = vadd.f32 %v2837_v51, %v2836_v47  ;;  %3090 = vmatmul.mubr.f32.gmra.mrb[34].mxu1 %v838_v41 }
 0x1b6   : > { %3092 = vmatprep.mubr.msk.f32.mxu1 %vm3439_vm0, %v3440_v22 }
 0x1b7   : > { %v786_v54 = vadd.f32 %v2838_v53, %v2774_v36  ;;  %v839_v55 = vadd.f32 %v783_v52, %v3803_v35 }
 0x1b9   : > { %3013 = vmatmul.mubr.f32.gmra.mrb[34].mxu0 %v839_v55  ;;  %3093 = vmatmul.mubr.f32.gmra.mrb[36].mxu1 %v839_v55  ;;  %v2775_v59 = vpop.f32.mrb[8].mxu0  ;;  %v2839_v60 = vpop.f32.mrb[8].mxu1  ;;  %v840_v5 = vadd.f32 %v786_v54, %v3803_v35 }
 0x1ba   : > { %3015 = vmatprep.mubr.msk.f32.mxu0 %vm3439_vm0, %v3440_v22  ;;  %3095 = vmatprep.mubr.msk.f32.mxu1 %vm3439_vm0, %v3440_v22  ;;  %v2776_v62 = vpop.f32.mrb[9].mxu0  ;;  %v2840_v63 = vpop.f32.mrb[9].mxu1 }
 0x1bb   : > { %v2777_v0 = vadd.f32 %v2776_v62, %v2775_v59  ;;  %v2841_v6 = vadd.f32 %v2840_v63, %v2839_v60  ;;  %v2778_v2 = vpop.f32.mrb[10].mxu0  ;;  %v2842_v7 = vpop.f32.mrb[10].mxu1 }
 0x1bc   : > { %v2779_v49 = vpop.f32.mrb[11].mxu0  ;;  %v2843_v8 = vpop.f32.mrb[11].mxu1 }
 0x1bd   : > { %3016 = vmatmul.mubr.f32.gmra.mrb[36].mxu0 %v840_v5  ;;  %3096 = vmatmul.mubr.f32.gmra.mrb[38].mxu1 %v840_v5  ;;  %v791_v46 = vadd.f32 %v2841_v6, %v2777_v0  ;;  %v2780_v9 = vadd.f32 %v2779_v49, %v2778_v2  ;;  %v2844_v11 = vadd.f32 %v2843_v8, %v2842_v7 }
 0x1be   : > { %3018 = vmatprep.mubr.msk.f32.mxu0 %vm3439_vm0, %v3440_v22  ;;  %3098 = vmatprep.mubr.msk.f32.mxu1 %vm3439_vm0, %v3440_v22 }
 0x1bf   : > { %v794_v14 = vadd.f32 %v2844_v11, %v2780_v9  ;;  %v841_v15 = vadd.f32 %v791_v46, %v3803_v35 }
 0x1c1   : > { %v2781_v61 = vpop.f32.mrb[12].mxu0  ;;  %v2845_v3 = vpop.f32.mrb[12].mxu1  ;;  %3019 = vmatmul.mubr.f32.gmra.mrb[38].mxu0 %v841_v15  ;;  %3099 = vmatmul.mubr.f32.gmra.mrb[40].mxu1 %v841_v15  ;;  %v842_v19 = vadd.f32 %v794_v14, %v3803_v35 }
 0x1c2   : > { %v2782_v12 = vpop.f32.mrb[13].mxu0  ;;  %v2846_v10 = vpop.f32.mrb[13].mxu1  ;;  %3021 = vmatprep.mubr.msk.f32.mxu0 %vm3439_vm0, %v3440_v22  ;;  %3101 = vmatprep.mubr.msk.f32.mxu1 %vm3439_vm0, %v3440_v22 }
 0x1c3   : > { %v2783_v17 = vadd.f32 %v2782_v12, %v2781_v61  ;;  %v2847_v21 = vadd.f32 %v2846_v10, %v2845_v3  ;;  %v2784_v18 = vpop.f32.mrb[14].mxu0  ;;  %v2848_v13 = vpop.f32.mrb[14].mxu1 }
 0x1c4   : > { %v2785_v50 = vpop.f32.mrb[15].mxu0  ;;  %v2849_v20 = vpop.f32.mrb[15].mxu1 }
 0x1c5   : > { %v799_v24 = vadd.f32 %v2847_v21, %v2783_v17  ;;  %v2786_v25 = vadd.f32 %v2785_v50, %v2784_v18  ;;  %v2850_v27 = vadd.f32 %v2849_v20, %v2848_v13  ;;  %3022 = vmatmul.mubr.f32.gmra.mrb[40].mxu0 %v842_v19  ;;  %3102 = vmatmul.mubr.f32.gmra.mrb[42].mxu1 %v842_v19 }
 0x1c6   : > { %3024 = vmatprep.mubr.msk.f32.mxu0 %vm3439_vm0, %v3440_v22  ;;  %3104 = vmatprep.mubr.msk.f32.mxu1 %vm3439_vm0, %v3440_v22 }
 0x1c7   : > { %v802_v28 = vadd.f32 %v2850_v27, %v2786_v25  ;;  %v843_v30 = vadd.f32 %v799_v24, %v3803_v35 }
 0x1c9   : > { %v2787_v31 = vpop.f32.mrb[16].mxu0  ;;  %v2851_v32 = vpop.f32.mrb[16].mxu1  ;;  %3025 = vmatmul.mubr.f32.gmra.mrb[42].mxu0 %v843_v30  ;;  %3105 = vmatmul.mubr.f32.gmra.mrb[44].mxu1 %v843_v30  ;;  %v844_v33 = vadd.f32 %v802_v28, %v3803_v35 }
 0x1ca   : > { %v2788_v16 = vpop.f32.mrb[17].mxu0  ;;  %v2852_v26 = vpop.f32.mrb[17].mxu1  ;;  %3027 = vmatprep.mubr.msk.f32.mxu0 %vm3439_vm0, %v3440_v22  ;;  %3107 = vmatprep.mubr.msk.f32.mxu1 %vm3439_vm0, %v3440_v22 }
 0x1cb   : > { %v2789_v37 = vadd.f32 %v2788_v16, %v2787_v31  ;;  %v2853_v38 = vadd.f32 %v2852_v26, %v2851_v32  ;;  %v2790_v39 = vpop.f32.mrb[18].mxu0  ;;  %v2854_v29 = vpop.f32.mrb[18].mxu1 }
 0x1cc   : > { %v2791_v41 = vpop.f32.mrb[19].mxu0  ;;  %v2855_v40 = vpop.f32.mrb[19].mxu1 }
 0x1cd   : > { %v807_v42 = vadd.f32 %v2853_v38, %v2789_v37  ;;  %v2792_v43 = vadd.f32 %v2791_v41, %v2790_v39  ;;  %v2856_v44 = vadd.f32 %v2855_v40, %v2854_v29  ;;  %3028 = vmatmul.mubr.f32.gmra.mrb[44].mxu0 %v844_v33  ;;  %3108 = vmatmul.mubr.f32.gmra.mrb[46].mxu1 %v844_v33 }
 0x1ce   : > { %3030 = vmatprep.mubr.msk.f32.mxu0 %vm3439_vm0, %v3440_v22  ;;  %3110 = vmatprep.mubr.msk.f32.mxu1 %vm3439_vm0, %v3440_v22 }
 0x1cf   : > { %v810_v23 = vadd.f32 %v2856_v44, %v2792_v43  ;;  %v845_v34 = vadd.f32 %v807_v42, %v3803_v35 }
 0x1d1   : > { %v2793_v45 = vpop.f32.mrb[20].mxu0  ;;  %v2857_v47 = vpop.f32.mrb[20].mxu1  ;;  %3031 = vmatmul.mubr.f32.gmra.mrb[46].mxu0 %v845_v34  ;;  %3111 = vmatmul.mubr.f32.gmra.mrb[48].mxu1 %v845_v34  ;;  %v846_v55 = vadd.f32 %v810_v23, %v3803_v35  ;;  %v3878_v34 = vld [vmem:[#allocation4 + $0x2] ss:$0 sm:$0xff] }
 0x1d2   : > { %v2794_v48 = vpop.f32.mrb[21].mxu0  ;;  %v2858_v51 = vpop.f32.mrb[21].mxu1  ;;  %3033 = vmatprep.mubr.msk.f32.mxu0 %vm3439_vm0, %v3440_v22  ;;  %3113 = vmatprep.mubr.msk.f32.mxu1 %vm3439_vm0, %v3440_v22 }
 0x1d3   : > { %v2795_v52 = vadd.f32 %v2794_v48, %v2793_v45  ;;  %v2859_v36 = vadd.f32 %v2858_v51, %v2857_v47  ;;  %v2796_v53 = vpop.f32.mrb[22].mxu0  ;;  %v2860_v54 = vpop.f32.mrb[22].mxu1 }
 0x1d4   : > { %v2797_v59 = vpop.f32.mrb[23].mxu0  ;;  %v2861_v60 = vpop.f32.mrb[23].mxu1 }
 0x1d5   : > { %v815_v5 = vadd.f32 %v2859_v36, %v2795_v52  ;;  %v2798_v62 = vadd.f32 %v2797_v59, %v2796_v53  ;;  %v2862_v63 = vadd.f32 %v2861_v60, %v2860_v54  ;;  %3034 = vmatmul.mubr.f32.gmra.mrb[48].mxu0 %v846_v55  ;;  %3114 = vmatmul.mubr.f32.gmra.mrb[50].mxu1 %v846_v55  ;;  %v3881_v53 = vld [vmem:[#allocation2 + $0x610] ss:$0 sm:$0xff] }
 0x1d6   : > { %3036 = vmatprep.mubr.msk.f32.mxu0 %vm3439_vm0, %v3440_v22  ;;  %3116 = vmatprep.mubr.msk.f32.mxu1 %vm3439_vm0, %v3440_v22 }
 0x1d7   : > { %v818_v0 = vadd.f32 %v2862_v63, %v2798_v62  ;;  %v847_v6 = vadd.f32 %v815_v5, %v3803_v35 }
 0x1d9   : > { %v2799_v2 = vpop.f32.mrb[24].mxu0  ;;  %v2863_v7 = vpop.f32.mrb[24].mxu1  ;;  %3037 = vmatmul.mubr.f32.gmra.mrb[50].mxu0 %v847_v6  ;;  %3117 = vmatmul.mubr.f32.gmra.mrb[52].mxu1 %v847_v6  ;;  %v848_v15 = vadd.f32 %v818_v0, %v3803_v35 }
 0x1da   : > { %v2800_v49 = vpop.f32.mrb[25].mxu0  ;;  %v2864_v8 = vpop.f32.mrb[25].mxu1  ;;  %3039 = vmatprep.mubr.msk.f32.mxu0 %vm3439_vm0, %v3440_v22  ;;  %3119 = vmatprep.mubr.msk.f32.mxu1 %vm3439_vm0, %v3440_v22 }
 0x1db   : > { %v2801_v46 = vadd.f32 %v2800_v49, %v2799_v2  ;;  %v2865_v9 = vadd.f32 %v2864_v8, %v2863_v7  ;;  %v2802_v11 = vpop.f32.mrb[26].mxu0  ;;  %v2866_v14 = vpop.f32.mrb[26].mxu1 }
 0x1dc   : > { %v2803_v61 = vpop.f32.mrb[27].mxu0  ;;  %v2867_v3 = vpop.f32.mrb[27].mxu1 }
 0x1dd   : > { %v823_v12 = vadd.f32 %v2865_v9, %v2801_v46  ;;  %v2804_v10 = vadd.f32 %v2803_v61, %v2802_v11  ;;  %v2868_v17 = vadd.f32 %v2867_v3, %v2866_v14  ;;  %3040 = vmatmul.mubr.f32.gmra.mrb[52].mxu0 %v848_v15  ;;  %3120 = vmatmul.mubr.f32.gmra.mrb[54].mxu1 %v848_v15 }
 0x1de   : > { %3042 = vmatprep.mubr.msk.f32.mxu0 %vm3439_vm0, %v3440_v22  ;;  %3122 = vmatprep.mubr.msk.f32.mxu1 %vm3439_vm0, %v3440_v22 }
 0x1df   : > { %v826_v21 = vadd.f32 %v2868_v17, %v2804_v10  ;;  %v849_v18 = vadd.f32 %v823_v12, %v3803_v35 }
 0x1e1   : > { %v2805_v13 = vpop.f32.mrb[28].mxu0  ;;  %v2869_v19 = vpop.f32.mrb[28].mxu1  ;;  %3043 = vmatmul.mubr.f32.gmra.mrb[54].mxu0 %v849_v18  ;;  %3123 = vmatmul.mubr.f32.gmra.mrb[56].mxu1 %v849_v18  ;;  %v850_v30 = vadd.f32 %v826_v21, %v3803_v35 }
 0x1e2   : > { %v2806_v50 = vpop.f32.mrb[29].mxu0  ;;  %v2870_v20 = vpop.f32.mrb[29].mxu1  ;;  %3045 = vmatprep.mubr.msk.f32.mxu0 %vm3439_vm0, %v3440_v22  ;;  %3125 = vmatprep.mubr.msk.f32.mxu1 %vm3439_vm0, %v3440_v22 }
 0x1e3   : > { %v2807_v24 = vadd.f32 %v2806_v50, %v2805_v13  ;;  %v2871_v25 = vadd.f32 %v2870_v20, %v2869_v19  ;;  %v2808_v27 = vpop.f32.mrb[30].mxu0  ;;  %v2872_v28 = vpop.f32.mrb[30].mxu1 }
 0x1e4   : > { %v2809_v31 = vpop.f32.mrb[31].mxu0  ;;  %v2873_v32 = vpop.f32.mrb[31].mxu1 }
 0x1e5   : > { %v831_v16 = vadd.f32 %v2871_v25, %v2807_v24  ;;  %v2810_v26 = vadd.f32 %v2809_v31, %v2808_v27  ;;  %v2874_v37 = vadd.f32 %v2873_v32, %v2872_v28  ;;  %3046 = vmatmul.mubr.f32.gmra.mrb[56].mxu0 %v850_v30  ;;  %3126 = vmatmul.mubr.f32.gmra.mrb[58].mxu1 %v850_v30 }
 0x1e6   : > { %3048 = vmatprep.mubr.msk.f32.mxu0 %vm3439_vm0, %v3440_v22  ;;  %3128 = vmatprep.mubr.msk.f32.mxu1 %vm3439_vm0, %v3440_v22 }
 0x1e7   : > { %v834_v38 = vadd.f32 %v2874_v37, %v2810_v26  ;;  %v851_v39 = vadd.f32 %v831_v16, %v3803_v35 }
 0x1e9   : > { %3049 = vmatmul.mubr.f32.gmra.mrb[58].mxu0 %v851_v39  ;;  %3129 = vmatmul.mubr.f32.gmra.mrb[60].mxu1 %v851_v39  ;;  %v852_v29 = vadd.f32 %v834_v38, %v3803_v35  ;;  %v3883_v35 = vld [vmem:[#allocation2 + $0x611] ss:$0 sm:$0xff] }
 0x1ea   : > { %3051 = vmatprep.mubr.msk.f32.mxu0 %vm3439_vm0, %v3440_v22  ;;  %2092 = vmatprep.mubr.bf16.mxu1 %v3437_v1 }
 0x1ed   : > { %3052 = vmatmul.mubr.f32.gmra.mrb[60].mxu0 %v852_v29 }
 0x284   : > { %v1092_v33 = vpop.f32.mrb[32].mxu1 }
 0x285   : > { %v3088_v41 = vpop.f32.mrb[33].mxu1 }
 0x286   : > { %v952_v40 = vpop.f32.mrb[32].mxu0 }
 0x287   : > { %v1093_v42 = vadd.f32 %v1092_v33, %v952_v40  ;;  %v3011_v43 = vpop.f32.mrb[33].mxu0 }
 0x288   : > { %v1097_v44 = vpop.f32.mrb[34].mxu1 }
 0x289   : > { %v3091_v23 = vpop.f32.mrb[35].mxu1  ;;  %v1166_v48 = vadd.f32 %v1093_v42, %v3878_v34 }
 0x28b   : > { %v1184_v63 = vmul.f32 %v3881_v53, %v1166_v48 }
 0x28c   : > { %v957_v45 = vpop.f32.mrb[34].mxu0  ;;  %v1102_v47 = vpop.f32.mrb[36].mxu1 }
 0x28d   : > { %v1098_v51 = vadd.f32 %v1097_v44, %v957_v45  ;;  %v3014_v52 = vpop.f32.mrb[35].mxu0  ;;  %v3094_v36 = vpop.f32.mrb[37].mxu1 }
 0x28f   : > { %v1167_v54 = vadd.f32 %v1098_v51, %v3878_v34 }
 0x290   : > { %v962_v55 = vpop.f32.mrb[36].mxu0  ;;  %v1107_v59 = vpop.f32.mrb[38].mxu1 }
 0x291   : > { %v1103_v60 = vadd.f32 %v1102_v47, %v962_v55  ;;  %v3017_v5 = vpop.f32.mrb[37].mxu0  ;;  %v3097_v62 = vpop.f32.mrb[39].mxu1  ;;  %v1198_v0 = vmul.f32 %v3883_v35, %v1167_v54  ;;  %v1185_v49 = vmul.f32 %v3881_v53, %v1167_v54 }
 0x293   : > { %v1168_v6 = vadd.f32 %v1103_v60, %v3878_v34  ;;  %v1212_v2 = vadd.f32 %v1198_v0, %v1184_v63 }
 0x294   : > { %v967_v46 = vpop.f32.mrb[38].mxu0  ;;  %v1112_v9 = vpop.f32.mrb[40].mxu1 }
 0x295   : > { %v1227_v7 = vsel %vm1226_vm1, %v1212_v2, 0.0  ;;  %v1199_v8 = vmul.f32 %v3883_v35, %v1168_v6  ;;  %v1108_v11 = vadd.f32 %v1107_v59, %v967_v46  ;;  %v3020_v14 = vpop.f32.mrb[39].mxu0  ;;  %v3100_v15 = vpop.f32.mrb[41].mxu1  ;;  %v1186_v19 = vmul.f32 %v3881_v53, %v1168_v6 }
 0x296   : > { %1228 = vadd.xlane.f32.xlu0 %v1227_v7 }
 0x297   : > { %v1213_v61 = vadd.f32 %v1199_v8, %v1185_v49  ;;  %v1169_v3 = vadd.f32 %v1108_v11, %v3878_v34 }
 0x298   : > { %v972_v10 = vpop.f32.mrb[40].mxu0  ;;  %v1117_v17 = vpop.f32.mrb[42].mxu1 }
 0x299   : > { %v1230_v12 = vsel %vm1226_vm1, %v1213_v61, 0.0  ;;  %v1113_v21 = vadd.f32 %v1112_v9, %v972_v10  ;;  %v3023_v18 = vpop.f32.mrb[41].mxu0  ;;  %v3103_v13 = vpop.f32.mrb[43].mxu1  ;;  %v1200_v50 = vmul.f32 %v3883_v35, %v1169_v3  ;;  %v1187_v16 = vmul.f32 %v3881_v53, %v1169_v3 }
 0x29a   : > { %1231 = vadd.xlane.f32.xlu1 %v1230_v12 }
 0x29b   : > { %v1170_v20 = vadd.f32 %v1113_v21, %v3878_v34  ;;  %v1214_v24 = vadd.f32 %v1200_v50, %v1186_v19 }
 0x29c   : > { %v977_v25 = vpop.f32.mrb[42].mxu0  ;;  %v1122_v27 = vpop.f32.mrb[44].mxu1 }
 0x29d   : > { %v1118_v28 = vadd.f32 %v1117_v17, %v977_v25  ;;  %v3026_v30 = vpop.f32.mrb[43].mxu0  ;;  %v3106_v31 = vpop.f32.mrb[45].mxu1  ;;  %v1233_v32 = vsel %vm1226_vm1, %v1214_v24, 0.0  ;;  %v1201_v26 = vmul.f32 %v3883_v35, %v1170_v20  ;;  %v1188_v43 = vmul.f32 %v3881_v53, %v1170_v20 }
 0x29e   : > { %1234 = vadd.xlane.f32.xlu0 %v1233_v32 }
 0x29f   : > { %v1171_v37 = vadd.f32 %v1118_v28, %v3878_v34  ;;  %v1215_v38 = vadd.f32 %v1201_v26, %v1187_v16 }
 0x2a0   : > { %v982_v39 = vpop.f32.mrb[44].mxu0  ;;  %v1127_v29 = vpop.f32.mrb[46].mxu1 }
 0x2a1   : > { %v1123_v33 = vadd.f32 %v1122_v27, %v982_v39  ;;  %v3029_v41 = vpop.f32.mrb[45].mxu0  ;;  %v3109_v40 = vpop.f32.mrb[47].mxu1  ;;  %v1236_v42 = vsel %vm1226_vm1, %v1215_v38, 0.0  ;;  %v1202_v44 = vmul.f32 %v3883_v35, %v1171_v37  ;;  %v1189_v55 = vmul.f32 %v3881_v53, %v1171_v37 }
 0x2a2   : > { %1237 = vadd.xlane.f32.xlu0 %v1236_v42 }
 0x2a3   : > { %v1172_v23 = vadd.f32 %v1123_v33, %v3878_v34  ;;  %v1216_v45 = vadd.f32 %v1202_v44, %v1188_v43 }
 0x2a4   : > { %v987_v47 = vpop.f32.mrb[46].mxu0  ;;  %v1132_v48 = vpop.f32.mrb[48].mxu1 }
 0x2a5   : > { %v1128_v51 = vadd.f32 %v1127_v29, %v987_v47  ;;  %v3032_v52 = vpop.f32.mrb[47].mxu0  ;;  %v3112_v36 = vpop.f32.mrb[49].mxu1  ;;  %v1239_v54 = vsel %vm1226_vm1, %v1216_v45, 0.0  ;;  %v1203_v59 = vmul.f32 %v3883_v35, %v1172_v23  ;;  %v1190_v49 = vmul.f32 %v3881_v53, %v1172_v23 }
 0x2a6   : > { %1240 = vadd.xlane.f32.xlu1 %v1239_v54 }
 0x2a7   : > { %v1173_v60 = vadd.f32 %v1128_v51, %v3878_v34  ;;  %v1217_v5 = vadd.f32 %v1203_v59, %v1189_v55 }
 0x2a8   : > { %v992_v62 = vpop.f32.mrb[48].mxu0  ;;  %v1137_v63 = vpop.f32.mrb[50].mxu1 }
 0x2a9   : > { %v1133_v0 = vadd.f32 %v1132_v48, %v992_v62  ;;  %v3035_v6 = vpop.f32.mrb[49].mxu0  ;;  %v3115_v2 = vpop.f32.mrb[51].mxu1  ;;  %v1242_v7 = vsel %vm1226_vm1, %v1217_v5, 0.0  ;;  %v1204_v8 = vmul.f32 %v3883_v35, %v1173_v60  ;;  %v1191_v10 = vmul.f32 %v3881_v53, %v1173_v60 }
 0x2aa   : > { %1243 = vadd.xlane.f32.xlu0 %v1242_v7 }
 0x2ab   : > { %v1174_v46 = vadd.f32 %v1133_v0, %v3878_v34  ;;  %v1218_v9 = vadd.f32 %v1204_v8, %v1190_v49 }
 0x2ac   : > { %v997_v11 = vpop.f32.mrb[50].mxu0  ;;  %v1142_v14 = vpop.f32.mrb[52].mxu1 }
 0x2ad   : > { %v1138_v15 = vadd.f32 %v1137_v63, %v997_v11  ;;  %v3038_v61 = vpop.f32.mrb[51].mxu0  ;;  %v3118_v3 = vpop.f32.mrb[53].mxu1  ;;  %v1245_v12 = vsel %vm1226_vm1, %v1218_v9, 0.0  ;;  %v1205_v17 = vmul.f32 %v3883_v35, %v1174_v46  ;;  %v1192_v27 = vmul.f32 %v3881_v53, %v1174_v46 }
 0x2ae   : > { %1246 = vadd.xlane.f32.xlu1 %v1245_v12 }
 0x2af   : > { %v1175_v21 = vadd.f32 %v1138_v15, %v3878_v34  ;;  %v1219_v18 = vadd.f32 %v1205_v17, %v1191_v10 }
 0x2b0   : > { %v1002_v13 = vpop.f32.mrb[52].mxu0  ;;  %v1147_v19 = vpop.f32.mrb[54].mxu1 }
 0x2b1   : > { %v1143_v50 = vadd.f32 %v1142_v14, %v1002_v13  ;;  %v3041_v20 = vpop.f32.mrb[53].mxu0  ;;  %v3121_v24 = vpop.f32.mrb[55].mxu1  ;;  %v1248_v25 = vsel %vm1226_vm1, %v1219_v18, 0.0  ;;  %v1206_v28 = vmul.f32 %v3883_v35, %v1175_v21  ;;  %v1193_v29 = vmul.f32 %v3881_v53, %v1175_v21  ;;  %v1536_v21 = vld [vmem:[#allocation2 + $0x670] sm:$0xff]  ;;  %v1537_v18 = vld [vmem:[#allocation2 + $0x680] sm:$0xff] }
 0x2b2   : > { %1249 = vadd.xlane.f32.xlu0 %v1248_v25  ;;  %v3243_v13 = vpack.c.bf16 %v1537_v18, %v1536_v21  ;;  %v1539_v24 = vld [vmem:[#allocation2 + $0x6a0] sm:$0xff]  ;;  %v1938_v18 = vld [vmem:[#allocation2 + $0x810] sm:$0xff] }
 0x2b3   : > { %v1176_v30 = vadd.f32 %v1143_v50, %v3878_v34  ;;  %v1220_v31 = vadd.f32 %v1206_v28, %v1192_v27 }
 0x2b4   : > { %v1007_v32 = vpop.f32.mrb[54].mxu0  ;;  %v1152_v16 = vpop.f32.mrb[56].mxu1  ;;  %3244 = vmatprep.subr.bf16.mxu0 %v3243_v13 }
 0x2b5   : > { %v1148_v26 = vadd.f32 %v1147_v19, %v1007_v32  ;;  %v3044_v37 = vpop.f32.mrb[55].mxu0  ;;  %v3124_v38 = vpop.f32.mrb[57].mxu1  ;;  %v1251_v39 = vsel %vm1226_vm1, %v1220_v31, 0.0  ;;  %v1207_v33 = vmul.f32 %v3883_v35, %v1176_v30  ;;  %v1194_v48 = vmul.f32 %v3881_v53, %v1176_v30  ;;  %3246 = vmatpush3.bf16.msra.mxu0 %v3243_v13  ;;  %v1183_v19 = vld [vmem:[#allocation4 + $0x3] ss:$0 sm:$0xff] }
 0x2b6   : > { %1252 = vadd.xlane.f32.xlu1 %v1251_v39  ;;  %v1940_v13 = vld [vmem:[#allocation2 + $0x820] sm:$0xff] }
 0x2b7   : > { %v1177_v41 = vadd.f32 %v1148_v26, %v3878_v34  ;;  %v1221_v40 = vadd.f32 %v1207_v33, %v1193_v29 }
 0x2b8   : > { %v1012_v42 = vpop.f32.mrb[56].mxu0  ;;  %v1157_v43 = vpop.f32.mrb[58].mxu1 }
 0x2b9   : > { %v1153_v44 = vadd.f32 %v1152_v16, %v1012_v42  ;;  %v3047_v23 = vpop.f32.mrb[57].mxu0  ;;  %v3127_v45 = vpop.f32.mrb[59].mxu1  ;;  %v1254_v47 = vsel %vm1226_vm1, %v1221_v40, 0.0  ;;  %v1208_v51 = vmul.f32 %v3883_v35, %v1177_v41  ;;  %v1195_v63 = vmul.f32 %v3881_v53, %v1177_v41 }
 0x2ba   : > { %1255 = vadd.xlane.f32.xlu0 %v1254_v47  ;;  %v1533_v23 = vld [vmem:[#allocation2 + $0x640] sm:$0xff] }
 0x2bb   : > { %v1178_v52 = vadd.f32 %v1153_v44, %v3878_v34  ;;  %v1222_v36 = vadd.f32 %v1208_v51, %v1194_v48  ;;  %v1532_v44 = vld [vmem:[#allocation2 + $0x630] sm:$0xff] }
 0x2bc   : > { %v1017_v54 = vpop.f32.mrb[58].mxu0  ;;  %v1162_v55 = vpop.f32.mrb[60].mxu1  ;;  %v3973_v47 = vpack.c.bf16 %v1533_v23, %v1532_v44 }
 0x2bd   : > { %v1158_v59 = vadd.f32 %v1157_v43, %v1017_v54  ;;  %v3050_v60 = vpop.f32.mrb[59].mxu0  ;;  %v3130_v5 = vpop.f32.mrb[61].mxu1  ;;  %v1257_v62 = vsel %vm1226_vm1, %v1222_v36, 0.0  ;;  %v1209_v0 = vmul.f32 %v3883_v35, %v1178_v52  ;;  %v1196_v9 = vmul.f32 %v3881_v53, %v1178_v52 }
 0x2be   : > { %1258 = vadd.xlane.f32.xlu1 %v1257_v62  ;;  %v1927_v60 = vld [vmem:[#allocation2 + $0x7b8] sm:$0xff]  ;;  %v1929_v5 = vld [vmem:[#allocation2 + $0x7c8] sm:$0xff]  ;;  %v1926_v62 = vld [vmem:[#allocation2 + $0x7b0] sm:$0xff] }
 0x2bf   : > { %v1179_v6 = vadd.f32 %v1158_v59, %v3878_v34  ;;  %v1223_v2 = vadd.f32 %v1209_v0, %v1195_v63  ;;  %v3986_v63 = vpack.c.bf16 %v1929_v5, %v1927_v60  ;;  %v1928_v0 = vld [vmem:[#allocation2 + $0x7c0] sm:$0xff] }
 0x2c0   : > { %v1022_v7 = vpop.f32.mrb[60].mxu0  ;;  %v4030_v60 = vld [vmem:[#allocation2 + $0x621] ss:$0 sm:$0xff] }
 0x2c1   : > { %v1163_v49 = vadd.f32 %v1162_v55, %v1022_v7  ;;  %v3053_v8 = vpop.f32.mrb[61].mxu0  ;;  %v1260_v46 = vsel %vm1226_vm1, %v1223_v2, 0.0  ;;  %v1210_v11 = vmul.f32 %v3883_v35, %v1179_v6  ;;  %v1197_v3 = vmul.f32 %v3881_v53, %v1179_v6  ;;  %v1931_v6 = vld [vmem:[#allocation2 + $0x7d8] sm:$0xff]  ;;  %v1933_v2 = vld [vmem:[#allocation2 + $0x7e8] sm:$0xff]  ;;  %3259 = vmatprep.subr.bf16.mxu1 %v3986_v63 }
 0x2c2   : > { %1261 = vadd.xlane.f32.xlu0 %v1260_v46  ;;  %v3988_v7 = vpack.c.bf16 %v1928_v0, %v1926_v62  ;;  %v1930_v8 = vld [vmem:[#allocation2 + $0x7d0] sm:$0xff]  ;;  %v1932_v46 = vld [vmem:[#allocation2 + $0x7e0] sm:$0xff] }
 0x2c3   : > { %v1180_v14 = vadd.f32 %v1163_v49, %v3878_v34  ;;  %v1224_v15 = vadd.f32 %v1210_v11, %v1196_v9  ;;  %v3991_v49 = vpack.c.bf16 %v1933_v2, %v1931_v6  ;;  %v1935_v9 = vld [vmem:[#allocation2 + $0x7f8] sm:$0xff]  ;;  %v1937_v11 = vld [vmem:[#allocation2 + $0x808] sm:$0xff]  ;;  %v4034_v6 = vld [vmem:[#allocation4 + $0x4] ss:$0 sm:$0xff] }
 0x2c4   : > { %3267 = vmatpush1.bf16.msra.mxu1 %v3988_v7 }
 0x2c5   : > { %v1263_v61 = vsel %vm1226_vm1, %v1224_v15, 0.0  ;;  %v1211_v12 = vmul.f32 %v3883_v35, %v1180_v14  ;;  %v1538_v35 = vld [vmem:[#allocation2 + $0x690] sm:$0xff]  ;;  %3260 = vmatprep.subr.bf16.mxu1 %v3991_v49  ;;  %v3995_v14 = vpack.c.bf16 %v1932_v46, %v1930_v8  ;;  %v3997_v15 = vpack.c.bf16 %v1937_v11, %v1935_v9 }
 0x2c6   : > { %1264 = vadd.xlane.f32.xlu1 %v1263_v61  ;;  %v3247_v25 = vpack.c.bf16 %v1539_v24, %v1538_v35  ;;  %v1934_v61 = vld [vmem:[#allocation2 + $0x7f0] sm:$0xff] }
 0x2c7   : > { %v1225_v10 = vadd.f32 %v1211_v12, %v1197_v3  ;;  %v1936_v3 = vld [vmem:[#allocation2 + $0x800] sm:$0xff]  ;;  %v1939_v12 = vld [vmem:[#allocation2 + $0x818] sm:$0xff]  ;;  %v1942_v24 = vld [vmem:[#allocation2 + $0x830] sm:$0xff] }
 0x2c8   : > { %3248 = vmatprep.subr.bf16.mxu0 %v3247_v25  ;;  %3268 = vmatpush1.bf16.msra.mxu1 %v3995_v14 }
 0x2c9   : > { %v1266_v17 = vsel %vm1226_vm1, %v1225_v10, 0.0  ;;  %3250 = vmatpush3.bf16.msra.mxu0 %v3247_v25  ;;  %v1941_v10 = vld [vmem:[#allocation2 + $0x828] sm:$0xff]  ;;  %3261 = vmatprep.subr.bf16.mxu1 %v3997_v15  ;;  %v1944_v25 = vld [vmem:[#allocation2 + $0x840] sm:$0xff] }
 0x2ca   : > { %1267 = vadd.xlane.f32.xlu0 %v1266_v17  ;;  %3252 = vmatprep.subr.bf16.mxu0 %v3973_v47  ;;  %v4001_v17 = vpack.c.bf16 %v1936_v3, %v1934_v61  ;;  %v4003_v21 = vpack.c.bf16 %v1941_v10, %v1939_v12  ;;  %v1534_v61 = vld [vmem:[#allocation2 + $0x650] sm:$0xff]  ;;  %v1535_v3 = vld [vmem:[#allocation2 + $0x660] sm:$0xff] }
 0x2cc   : > { %3269 = vmatpush1.bf16.msra.mxu1 %v4001_v17 }
 0x2cd   : > { %3262 = vmatprep.subr.bf16.mxu1 %v4003_v21 }
 0x323   : > { %v3941_v50 = vpop.xlane.xlu0 %1228 }
 0x324   : > { %v1269_v34 = vadd.f32 %v3941_v50, %v1183_v19 }
 0x326   : > { %1404 = vperm.xlu1 %3359, %v1269_v34   ;;  %v1945_v34 = vld [vmem:[#allocation2 + $0x848] sm:$0xff] }
 0x327   : > { %v3944_v20 = vpop.xlane.xlu1 %1231 }
 0x328   : > { %v1270_v53 = vadd.f32 %v3944_v20, %v1183_v19 }
 0x32a   : > { %1409 = vperm.xlu0 %3358, %v1270_v53   ;;  %v4007_v53 = vpack.c.bf16 %v1940_v13, %v1938_v18  ;;  %v3255_v18 = vpack.c.bf16 %v1535_v3, %v1534_v61 }
 0x32b   : > { %v3947_v27 = vpop.xlane.xlu0 %1234 }
 0x32c   : > { %v1271_v28 = vadd.f32 %v3947_v27, %v1183_v19  ;;  %3270 = vmatpush1.bf16.msra.mxu1 %v4007_v53 }
 0x32e   : > { %1414 = vperm.xlu1 %3359, %v1271_v28   ;;  %v1947_v28 = vld [vmem:[#allocation2 + $0x858] sm:$0xff] }
 0x32f   : > { %v3950_v30 = vpop.xlane.xlu0 %1237 }
 0x330   : > { %v1272_v31 = vadd.f32 %v3950_v30, %v1183_v19 }
 0x332   : > { %1419 = vperm.xlu1 %3359, %v1272_v31   ;;  %v1949_v31 = vld [vmem:[#allocation2 + $0x868] sm:$0xff] }
 0x333   : > { %v3953_v32 = vpop.xlane.xlu1 %1240 }
 0x334   : > { %v1273_v16 = vadd.f32 %v3953_v32, %v1183_v19 }
 0x336   : > { %1424 = vperm.xlu0 %3358, %v1273_v16   ;;  %v4013_v16 = vpack.c.bf16 %v1944_v25, %v1942_v24 }
 0x337   : > { %v3956_v26 = vpop.xlane.xlu0 %1243 }
 0x338   : > { %v1274_v37 = vadd.f32 %v3956_v26, %v1183_v19 }
 0x33a   : > { %1429 = vperm.xlu1 %3359, %v1274_v37   ;;  %v4015_v37 = vpack.c.bf16 %v1949_v31, %v1947_v28 }
 0x33b   : > { %v3959_v38 = vpop.xlane.xlu1 %1246 }
 0x33c   : > { %v1275_v39 = vadd.f32 %v3959_v38, %v1183_v19 }
 0x33e   : > { %1434 = vperm.xlu0 %3358, %v1275_v39   ;;  %v1946_v39 = vld [vmem:[#allocation2 + $0x850] sm:$0xff] }
 0x33f   : > { %v3962_v29 = vpop.xlane.xlu0 %1249 }
 0x340   : > { %v1276_v33 = vadd.f32 %v3962_v29, %v1183_v19 }
 0x342   : > { %1439 = vperm.xlu1 %3359, %v1276_v33   ;;  %v1948_v33 = vld [vmem:[#allocation2 + $0x860] sm:$0xff] }
 0x343   : > { %v3965_v41 = vpop.xlane.xlu1 %1252  ;;  %v4019_v44 = vpack.c.bf16 %v1948_v33, %v1946_v39 }
 0x344   : > { %v1277_v40 = vadd.f32 %v3965_v41, %v1183_v19 }
 0x346   : > { %1444 = vperm.xlu0 %3358, %v1277_v40   ;;  %v1951_v40 = vld [vmem:[#allocation2 + $0x878] sm:$0xff] }
 0x347   : > { %v3968_v42 = vpop.xlane.xlu0 %1255 }
 0x348   : > { %v1278_v43 = vadd.f32 %v3968_v42, %v1183_v19 }
 0x34a   : > { %1449 = vperm.xlu1 %3359, %v1278_v43   ;;  %v1953_v43 = vld [vmem:[#allocation2 + $0x888] sm:$0xff] }
 0x34b   : > { %v3971_v45 = vpop.xlane.xlu1 %1258  ;;  %v4021_v23 = vpack.c.bf16 %v1953_v43, %v1951_v40 }
 0x34c   : > { %v1279_v48 = vadd.f32 %v3971_v45, %v1183_v19 }
 0x34e   : > { %1454 = vperm.xlu0 %3358, %v1279_v48   ;;  %v1950_v48 = vld [vmem:[#allocation2 + $0x870] sm:$0xff] }
 0x34f   : > { %v3977_v51 = vpop.xlane.xlu0 %1261 }
 0x350   : > { %v1280_v52 = vadd.f32 %v3977_v51, %v1183_v19 }
 0x352   : > { %1459 = vperm.xlu1 %3359, %v1280_v52   ;;  %v1952_v52 = vld [vmem:[#allocation2 + $0x880] sm:$0xff] }
 0x353   : > { %v3980_v36 = vpop.xlane.xlu1 %1264 }
 0x354   : > { %v1281_v54 = vadd.f32 %v3980_v36, %v1183_v19 }
 0x356   : > { %1464 = vperm.xlu0 %3358, %v1281_v54   ;;  %v4025_v54 = vpack.c.bf16 %v1952_v52, %v1950_v48 }
 0x357   : > { %v3983_v55 = vpop.xlane.xlu0 %1267 }
 0x358   : > { %v1282_v59 = vadd.f32 %v3983_v55, %v1183_v19  ;;  %v1943_v19 = vld [vmem:[#allocation2 + $0x838] sm:$0xff] }
 0x359   : > { %v4009_v35 = vpack.c.bf16 %v1945_v34, %v1943_v19 }
 0x35a   : > { %1469 = vperm.xlu1 %3359, %v1282_v59   ;;  %v4027_v59 = vld [vmem:[#allocation2 + $0x620] ss:$0 sm:$0xff] }
 0x35b   : > { %3263 = vmatprep.subr.bf16.mxu1 %v4009_v35  ;;  %v1472_v5 = vmul.f32 0.0, %v4027_v59 }
 0x35c   : > { %3271 = vmatpush1.bf16.msra.mxu1 %v4013_v16 }
 0x35d   : > { %3264 = vmatprep.subr.bf16.mxu1 %v4015_v37 }
 0x360   : > { %3272 = vmatpush1.bf16.msra.mxu1 %v4019_v44 }
 0x361   : > { %3265 = vmatprep.subr.bf16.mxu1 %v4021_v23 }
 0x364   : > { %3273 = vmatpush1.bf16.msra.mxu1 %v4025_v54 }
 0x3a5   : > { %v1405_v62 = vpop.permute.xlu1 %1404 }
 0x3a6   : > { %v1487_v0 = vmul.f32 %v1405_v62, %v4030_v60  ;;  %v1473_v46 = vmul.f32 %v1405_v62, %v4027_v59 }
 0x3a8   : > { %v1502_v2 = vadd.f32 %v1487_v0, %v1472_v5 }
 0x3a9   : > { %v1410_v8 = vpop.permute.xlu0 %1409 }
 0x3aa   : > { %v4038_v9 = vadd.f32 %v1502_v2, %v4034_v6  ;;  %v1488_v11 = vmul.f32 %v1410_v8, %v4030_v60  ;;  %v1474_v19 = vmul.f32 %v1410_v8, %v4027_v59 }
 0x3ac   : > { %v1503_v12 = vadd.f32 %v1488_v11, %v1473_v46  ;;  %3139 = vmatprep.mubr.msk.f32.mxu0 %vm1226_vm1, %v4038_v9 }
 0x3ad   : > { %v1415_v13 = vpop.permute.xlu1 %1414 }
 0x3ae   : > { %v4044_v10 = vadd.f32 %v1503_v12, %v4034_v6  ;;  %v1489_v34 = vmul.f32 %v1415_v13, %v4030_v60  ;;  %v1475_v28 = vmul.f32 %v1415_v13, %v4027_v59 }
 0x3b0   : > { %3140 = vmatmul.mubr.msk.f32.vlgmr.msra.gmra.mrb[62].mxu0 %vm1226_vm1, %v4044_v10  ;;  %v1504_v24 = vadd.f32 %v1489_v34, %v1474_v19 }
 0x3b1   : > { %3254 = vmatpush3.bf16.msra.mxu0 %v3973_v47  ;;  %v1420_v25 = vpop.permute.xlu1 %1419 }
 0x3b2   : > { %3256 = vmatprep.subr.bf16.mxu0 %v3255_v18  ;;  %v4053_v31 = vadd.f32 %v1504_v24, %v4034_v6  ;;  %v1490_v39 = vmul.f32 %v1420_v25, %v4030_v60  ;;  %v1476_v47 = vmul.f32 %v1420_v25, %v4027_v59 }
 0x3b4   : > { %v1505_v33 = vadd.f32 %v1490_v39, %v1475_v28  ;;  %3142 = vmatprep.mubr.msk.f32.mxu0 %vm1226_vm1, %v4053_v31 }
 0x3b5   : > { %3258 = vmatpush3.bf16.msra.mxu0 %v3255_v18  ;;  %v1425_v40 = vpop.permute.xlu0 %1424 }
 0x3b6   : > { %2010 = vmatprep.subr.bf16.mxu0 %v3986_v63  ;;  %v4061_v43 = vadd.f32 %v1505_v33, %v4034_v6  ;;  %v1491_v48 = vmul.f32 %v1425_v40, %v4030_v60  ;;  %v1477_v62 = vmul.f32 %v1425_v40, %v4027_v59 }
 0x3b8   : > { %v1506_v52 = vadd.f32 %v1491_v48, %v1476_v47  ;;  %3143 = vmatmul.mubr.msk.f32.gmra.mrb[64].mxu0 %vm1226_vm1, %v4061_v43 }
 0x3b9   : > { %v1430_v5 = vpop.permute.xlu1 %1429 }
 0x3ba   : > { %v4068_v0 = vadd.f32 %v1506_v52, %v4034_v6  ;;  %v1492_v63 = vmul.f32 %v1430_v5, %v4030_v60  ;;  %v1478_v46 = vmul.f32 %v1430_v5, %v4027_v59 }
 0x3bc   : > { %v1507_v2 = vadd.f32 %v1492_v63, %v1477_v62  ;;  %3145 = vmatprep.mubr.msk.f32.mxu0 %vm1226_vm1, %v4068_v0 }
 0x3bd   : > { %v1435_v8 = vpop.permute.xlu0 %1434 }
 0x3be   : > { %v4075_v11 = vadd.f32 %v1507_v2, %v4034_v6  ;;  %v1493_v61 = vmul.f32 %v1435_v8, %v4030_v60  ;;  %v1479_v18 = vmul.f32 %v1435_v8, %v4027_v59 }
 0x3c0   : > { %v1508_v3 = vadd.f32 %v1493_v61, %v1478_v46  ;;  %3146 = vmatmul.mubr.msk.f32.gmra.mrb[66].mxu0 %vm1226_vm1, %v4075_v11 }
 0x3c1   : > { %v1440_v12 = vpop.permute.xlu1 %1439 }
 0x3c2   : > { %v1523_v13 = vadd.f32 %v1508_v3, %v4034_v6  ;;  %v1494_v19 = vmul.f32 %v1440_v12, %v4030_v60  ;;  %v1480_v25 = vmul.f32 %v1440_v12, %v4027_v59 }
 0x3c4   : > { %v1509_v34 = vadd.f32 %v1494_v19, %v1479_v18  ;;  %3148 = vmatprep.mubr.msk.f32.mxu0 %vm1226_vm1, %v1523_v13 }
 0x3c5   : > { %v1445_v24 = vpop.permute.xlu0 %1444 }
 0x3c6   : > { %v1524_v28 = vadd.f32 %v1509_v34, %v4034_v6  ;;  %v1495_v39 = vmul.f32 %v1445_v24, %v4030_v60  ;;  %v1481_v47 = vmul.f32 %v1445_v24, %v4027_v59 }
 0x3c8   : > { %v1510_v33 = vadd.f32 %v1495_v39, %v1480_v25  ;;  %3149 = vmatmul.mubr.msk.f32.gmra.mrb[68].mxu0 %vm1226_vm1, %v1524_v28 }
 0x3c9   : > { %v1450_v40 = vpop.permute.xlu1 %1449 }
 0x3ca   : > { %v1525_v48 = vadd.f32 %v1510_v33, %v4034_v6  ;;  %v1496_v52 = vmul.f32 %v1450_v40, %v4030_v60  ;;  %v1482_v63 = vmul.f32 %v1450_v40, %v4027_v59  ;;  %v1501_v40 = vmul.f32 0.0, %v4030_v60 }
 0x3cc   : > { %v1511_v5 = vadd.f32 %v1496_v52, %v1481_v47  ;;  %3151 = vmatprep.mubr.msk.f32.mxu0 %vm1226_vm1, %v1525_v48 }
 0x3cd   : > { %v1455_v62 = vpop.permute.xlu0 %1454 }
 0x3ce   : > { %v1526_v2 = vadd.f32 %v1511_v5, %v4034_v6  ;;  %v1497_v8 = vmul.f32 %v1455_v62, %v4030_v60  ;;  %v1483_v3 = vmul.f32 %v1455_v62, %v4027_v59 }
 0x3d0   : > { %v1512_v46 = vadd.f32 %v1497_v8, %v1482_v63  ;;  %3152 = vmatmul.mubr.msk.f32.gmra.mrb[70].mxu0 %vm1226_vm1, %v1526_v2 }
 0x3d1   : > { %v1460_v61 = vpop.permute.xlu1 %1459 }
 0x3d2   : > { %v1527_v12 = vadd.f32 %v1512_v46, %v4034_v6  ;;  %v1498_v18 = vmul.f32 %v1460_v61, %v4030_v60  ;;  %v1484_v24 = vmul.f32 %v1460_v61, %v4027_v59 }
 0x3d4   : > { %v1513_v19 = vadd.f32 %v1498_v18, %v1483_v3  ;;  %3154 = vmatprep.mubr.msk.f32.mxu0 %vm1226_vm1, %v1527_v12 }
 0x3d5   : > { %v1465_v34 = vpop.permute.xlu0 %1464 }
 0x3d6   : > { %v1528_v25 = vadd.f32 %v1513_v19, %v4034_v6  ;;  %v1499_v39 = vmul.f32 %v1465_v34, %v4030_v60  ;;  %v1485_v52 = vmul.f32 %v1465_v34, %v4027_v59 }
 0x3d8   : > { %v1514_v33 = vadd.f32 %v1499_v39, %v1484_v24  ;;  %3155 = vmatmul.mubr.msk.f32.gmra.mrb[72].mxu0 %vm1226_vm1, %v1528_v25 }
 0x3d9   : > { %v1470_v47 = vpop.permute.xlu1 %1469 }
 0x3da   : > { %v1529_v5 = vadd.f32 %v1514_v33, %v4034_v6  ;;  %v1486_v62 = vmul.f32 %v1470_v47, %v4027_v59  ;;  %v1500_v63 = vmul.f32 %v1470_v47, %v4030_v60 }
 0x3dc   : > { %v1515_v8 = vadd.f32 %v1500_v63, %v1485_v52  ;;  %v1516_v46 = vadd.f32 %v1501_v40, %v1486_v62  ;;  %3157 = vmatprep.mubr.msk.f32.mxu0 %vm1226_vm1, %v1529_v5 }
 0x3de   : > { %v1530_v61 = vadd.f32 %v1515_v8, %v4034_v6  ;;  %v1531_v3 = vadd.f32 %v1516_v46, %v4034_v6  ;;  %v1894_v8 = vld [vmem:[#allocation2 + $0x6b0] sm:$0xff]  ;;  %v1896_v46 = vld [vmem:[#allocation2 + $0x6c0] sm:$0xff] }
 0x3e0   : > { %3158 = vmatmul.mubr.msk.f32.gmra.mrb[74].mxu0 %vm1226_vm1, %v1530_v61 }
 0x3e1   : > { %3160 = vmatprep.mubr.msk.f32.mxu0 %vm1226_vm1, %v1531_v3 }
 0x3e4   : > { %3161 = vmatmul.mubr.f32.gmra.mrb[76].mxu0 %v3440_v22 }
 0x3e5   : > { %3171 = vmatprep.mubr.f32.mxu0 %v3440_v22 }
 0x3e8   : > { %3172 = vmatmul.mubr.msk.f32.vlgmr.msra.gmra.mrb[62].mxu0 %vm1226_vm1, %v4038_v9 }
 0x3e9   : > { %3174 = vmatprep.mubr.msk.f32.mxu0 %vm1226_vm1, %v4044_v10  ;;  %2011 = vmatpush1.bf16.msra.mxu0 %v3988_v7  ;;  %v1955_v7 = vld [vmem:[#allocation2 + $0x898] sm:$0xff] }
 0x3ea   : > { %2012 = vmatprep.subr.bf16.mxu0 %v3991_v49  ;;  %v1957_v49 = vld [vmem:[#allocation2 + $0x8a8] sm:$0xff] }
 0x3ec   : > { %3175 = vmatmul.mubr.msk.f32.gmra.mrb[64].mxu0 %vm1226_vm1, %v4053_v31 }
 0x3ed   : > { %3177 = vmatprep.mubr.msk.f32.mxu0 %vm1226_vm1, %v4061_v43  ;;  %2013 = vmatpush1.bf16.msra.mxu0 %v3995_v14  ;;  %v1954_v14 = vld [vmem:[#allocation2 + $0x890] sm:$0xff] }
 0x3ee   : > { %2014 = vmatprep.subr.bf16.mxu0 %v3997_v15  ;;  %v2009_v15 = vpack.c.bf16 %v1957_v49, %v1955_v7  ;;  %v1899_v7 = vld [vmem:[#allocation2 + $0x6d8] sm:$0xff]  ;;  %v1901_v49 = vld [vmem:[#allocation2 + $0x6e8] sm:$0xff] }
 0x3f0   : > { %3178 = vmatmul.mubr.msk.f32.gmra.mrb[66].mxu0 %vm1226_vm1, %v4068_v0  ;;  %3266 = vmatprep.subr.bf16.mxu1 %v2009_v15 }
 0x3f1   : > { %3180 = vmatprep.mubr.msk.f32.mxu0 %vm1226_vm1, %v4075_v11  ;;  %2015 = vmatpush1.bf16.msra.mxu0 %v4001_v17  ;;  %v1956_v17 = vld [vmem:[#allocation2 + $0x8a0] sm:$0xff] }
 0x3f2   : > { %2016 = vmatprep.subr.bf16.mxu0 %v4003_v21  ;;  %v2008_v21 = vpack.c.bf16 %v1956_v17, %v1954_v14 }
 0x3f4   : > { %3181 = vmatmul.mubr.msk.f32.gmra.mrb[68].mxu0 %vm1226_vm1, %v1523_v13  ;;  %3274 = vmatpush1.bf16.msra.mxu1 %v2008_v21 }
 0x3f5   : > { %3183 = vmatprep.mubr.msk.f32.mxu0 %vm1226_vm1, %v1524_v28  ;;  %2017 = vmatpush1.bf16.msra.mxu0 %v4007_v53  ;;  %v1895_v53 = vld [vmem:[#allocation2 + $0x6b8] sm:$0xff] }
 0x3f6   : > { %2018 = vmatprep.subr.bf16.mxu0 %v4009_v35  ;;  %v1897_v35 = vld [vmem:[#allocation2 + $0x6c8] sm:$0xff] }
 0x3f8   : > { %3184 = vmatmul.mubr.msk.f32.gmra.mrb[70].mxu0 %vm1226_vm1, %v1525_v48 }
 0x3f9   : > { %3186 = vmatprep.mubr.msk.f32.mxu0 %vm1226_vm1, %v1526_v2  ;;  %2019 = vmatpush1.bf16.msra.mxu0 %v4013_v16  ;;  %v1979_v16 = vpack.c.bf16 %v1897_v35, %v1895_v53  ;;  %v1981_v35 = vpack.c.bf16 %v1901_v49, %v1899_v7 }
 0x3fa   : > { %2020 = vmatprep.subr.bf16.mxu0 %v4015_v37  ;;  %v4151_v37 = vld [vmem:[#allocation4 + $0x5] ss:$0 sm:$0xff] }
 0x3fb   : > { %2131 = vmatprep.subr.bf16.mxu1 %v1979_v16  ;;  %v1898_v16 = vld [vmem:[#allocation2 + $0x6d0] sm:$0xff] }
 0x3fc   : > { %3187 = vmatmul.mubr.msk.f32.gmra.mrb[72].mxu0 %vm1226_vm1, %v1527_v12 }
 0x3fd   : > { %3189 = vmatprep.mubr.msk.f32.mxu0 %vm1226_vm1, %v1528_v25  ;;  %2021 = vmatpush1.bf16.msra.mxu0 %v4019_v44 }
 0x3fe   : > { %2022 = vmatprep.subr.bf16.mxu0 %v4021_v23 }
 0x400   : > { %3190 = vmatmul.mubr.msk.f32.gmra.mrb[74].mxu0 %vm1226_vm1, %v1529_v5 }
 0x401   : > { %3192 = vmatprep.mubr.msk.f32.mxu0 %vm1226_vm1, %v1530_v61  ;;  %2023 = vmatpush1.bf16.msra.mxu0 %v4025_v54 }
 0x402   : > { %2024 = vmatprep.subr.bf16.mxu0 %v2009_v15  ;;  %v1978_v15 = vpack.c.bf16 %v1896_v46, %v1894_v8  ;;  %v1907_v46 = vld [vmem:[#allocation2 + $0x718] sm:$0xff] }
 0x404   : > { %3193 = vmatmul.mubr.msk.f32.gmra.mrb[76].mxu0 %vm1226_vm1, %v1531_v3 }
 0x405   : > { %2042 = vmatprep.mubr.bf16.mxu0 %v3437_v1  ;;  %2025 = vmatpush1.bf16.msra.mxu0 %v2008_v21 }
 0x4bb   : > { %v3173_v44 = vpop.f32.mrb[62].mxu0 }
 0x4bc   : > { %v4154_v23 = vadd.f32 %v3173_v44, %v4151_v37  ;;  %v1799_v54 = vpop.f32.mrb[63].mxu0  ;;  %v1900_v44 = vld [vmem:[#allocation2 + $0x6e0] sm:$0xff] }
 0x4bd   : > { %v4157_v59 = vadd.f32 %v1799_v54, %v4151_v37 }
 0x4bf   : > { %v1969_v60 = vpack.c.bf16 %v4154_v23, %v4157_v59  ;;  %v3176_v6 = vpop.f32.mrb[64].mxu0 }
 0x4c0   : > { %v4162_v9 = vadd.f32 %v3176_v6, %v4151_v37  ;;  %v1809_v10 = vpop.f32.mrb[65].mxu0  ;;  %v1903_v6 = vld [vmem:[#allocation2 + $0x6f8] sm:$0xff] }
 0x4c1   : > { %v4165_v31 = vadd.f32 %v1809_v10, %v4151_v37  ;;  %2043 = vmatmul.mubr.bf16.vlgmr.msra.gmra.mrb[80].mxu0 %v1969_v60  ;;  %v1905_v10 = vld [vmem:[#allocation2 + $0x708] sm:$0xff] }
 0x4c2   : > { %2052 = vmatprep.mubr.bf16.mxu0 %v3437_v1 }
 0x4c3   : > { %v1961_v43 = vpack.c.bf16 %v4165_v31, %v4154_v23  ;;  %v1970_v0 = vpack.c.bf16 %v4162_v9, %v4165_v31  ;;  %v3179_v11 = vpop.f32.mrb[66].mxu0 }
 0x4c4   : > { %v4173_v13 = vadd.f32 %v3179_v11, %v4151_v37  ;;  %v1819_v28 = vpop.f32.mrb[67].mxu0  ;;  %v1980_v11 = vpack.c.bf16 %v1900_v44, %v1898_v16  ;;  %v1908_v16 = vld [vmem:[#allocation2 + $0x720] sm:$0xff]  ;;  %v1911_v44 = vld [vmem:[#allocation2 + $0x738] sm:$0xff] }
 0x4c5   : > { %v4176_v48 = vadd.f32 %v1819_v28, %v4151_v37 }
 0x4c7   : > { %v1962_v2 = vpack.c.bf16 %v4176_v48, %v4162_v9  ;;  %v1971_v12 = vpack.c.bf16 %v4173_v13, %v4176_v48  ;;  %v3182_v18 = vpop.f32.mrb[68].mxu0 }
 0x4c8   : > { %v4183_v19 = vadd.f32 %v3182_v18, %v4151_v37  ;;  %v1829_v34 = vpop.f32.mrb[69].mxu0 }
 0x4c9   : > { %v4186_v24 = vadd.f32 %v1829_v34, %v4151_v37  ;;  %2053 = vmatmul.mubr.bf16.gmra.mrb[84].mxu0 %v1970_v0  ;;  %v1983_v34 = vpack.c.bf16 %v1905_v10, %v1903_v6  ;;  %v1910_v6 = vld [vmem:[#allocation2 + $0x730] sm:$0xff]  ;;  %v1912_v10 = vld [vmem:[#allocation2 + $0x740] sm:$0xff] }
 0x4ca   : > { %2062 = vmatprep.mubr.bf16.mxu0 %v3437_v1 }
 0x4cb   : > { %v1963_v25 = vpack.c.bf16 %v4186_v24, %v4173_v13  ;;  %v1972_v39 = vpack.c.bf16 %v4183_v19, %v4186_v24  ;;  %v3185_v33 = vpop.f32.mrb[70].mxu0 }
 0x4cc   : > { %v4194_v40 = vadd.f32 %v3185_v33, %v4151_v37  ;;  %v1839_v47 = vpop.f32.mrb[71].mxu0  ;;  %v1902_v33 = vld [vmem:[#allocation2 + $0x6f0] sm:$0xff] }
 0x4cd   : > { %v4197_v52 = vadd.f32 %v1839_v47, %v4151_v37  ;;  %v1904_v47 = vld [vmem:[#allocation2 + $0x700] sm:$0xff] }
 0x4ce   : > { %v1982_v49 = vpack.c.bf16 %v1904_v47, %v1902_v33  ;;  %v1986_v33 = vpack.c.bf16 %v1912_v10, %v1910_v6  ;;  %v1914_v47 = vld [vmem:[#allocation2 + $0x750] sm:$0xff]  ;;  %v1960_v6 = vpack.c.bf16 %v4157_v59, %v3440_v22 }
 0x4cf   : > { %v1964_v5 = vpack.c.bf16 %v4197_v52, %v4183_v19  ;;  %v1973_v62 = vpack.c.bf16 %v4194_v40, %v4197_v52  ;;  %v3188_v63 = vpop.f32.mrb[72].mxu0 }
 0x4d0   : > { %v4204_v61 = vadd.f32 %v3188_v63, %v4151_v37  ;;  %v1849_v3 = vpop.f32.mrb[73].mxu0 }
 0x4d1   : > { %v4207_v14 = vadd.f32 %v1849_v3, %v4151_v37  ;;  %2063 = vmatmul.mubr.bf16.gmra.mrb[88].mxu0 %v1971_v12  ;;  %v1909_v3 = vld [vmem:[#allocation2 + $0x728] sm:$0xff] }
 0x4d2   : > { %2072 = vmatprep.mubr.bf16.mxu0 %v3437_v1 }
 0x4d3   : > { %v1965_v17 = vpack.c.bf16 %v4207_v14, %v4194_v40  ;;  %v1974_v21 = vpack.c.bf16 %v4204_v61, %v4207_v14  ;;  %v3191_v53 = vpop.f32.mrb[74].mxu0 }
 0x4d4   : > { %v4215_v54 = vadd.f32 %v3191_v53, %v4151_v37  ;;  %v1859_v60 = vpop.f32.mrb[75].mxu0  ;;  %v1985_v53 = vpack.c.bf16 %v1909_v3, %v1907_v46  ;;  %v1919_v46 = vld [vmem:[#allocation2 + $0x778] sm:$0xff]  ;;  %v1921_v3 = vld [vmem:[#allocation2 + $0x788] sm:$0xff] }
 0x4d5   : > { %v4218_v0 = vadd.f32 %v1859_v60, %v4151_v37  ;;  %2093 = vmatmul.mubr.bf16.vlgmr.msra.gmra.mrb[64].mxu1 %v1974_v21  ;;  %v1913_v60 = vld [vmem:[#allocation2 + $0x748] sm:$0xff] }
 0x4d6   : > { %2132 = vmatpush1.bf16.msra.mxu1 %v1978_v15  ;;  %2102 = vmatprep.mubr.bf16.mxu1 %v3437_v1 }
 0x4d7   : > { %v1966_v28 = vpack.c.bf16 %v4218_v0, %v4204_v61  ;;  %v1975_v12 = vpack.c.bf16 %v4215_v54, %v4218_v0  ;;  %v3194_v18 = vpop.f32.mrb[76].mxu0  ;;  %2133 = vmatprep.subr.bf16.mxu1 %v1981_v35  ;;  %v1906_v35 = vld [vmem:[#allocation2 + $0x710] sm:$0xff] }
 0x4d8   : > { %v4226_v63 = vadd.f32 %v3194_v18, %v4151_v37  ;;  %v1869_v8 = vpop.f32.mrb[77].mxu0  ;;  %v1917_v18 = vld [vmem:[#allocation2 + $0x768] sm:$0xff] }
 0x4d9   : > { %v4229_v7 = vadd.f32 %v1869_v8, %v4151_v37  ;;  %2073 = vmatmul.mubr.bf16.gmra.mrb[92].mxu0 %v1972_v39  ;;  %v1984_v37 = vpack.c.bf16 %v1908_v16, %v1906_v35  ;;  %v1987_v39 = vpack.c.bf16 %v1913_v60, %v1911_v44  ;;  %v1916_v8 = vld [vmem:[#allocation2 + $0x760] sm:$0xff]  ;;  %v1923_v16 = vld [vmem:[#allocation2 + $0x798] sm:$0xff]  ;;  %v1925_v44 = vld [vmem:[#allocation2 + $0x7a8] sm:$0xff] }
 0x4da   : > { %2134 = vmatpush1.bf16.msra.mxu1 %v1980_v11  ;;  %2082 = vmatprep.mubr.bf16.mxu0 %v3437_v1  ;;  %v1915_v11 = vld [vmem:[#allocation2 + $0x758] sm:$0xff]  ;;  %v1920_v35 = vld [vmem:[#allocation2 + $0x780] sm:$0xff]  ;;  %v1993_v60 = vpack.c.bf16 %v1925_v44, %v1923_v16 }
 0x4db   : > { %v1967_v15 = vpack.c.bf16 %v4229_v7, %v4215_v54  ;;  %v1976_v21 = vpack.c.bf16 %v4226_v63, %v4229_v7  ;;  %2135 = vmatprep.subr.bf16.mxu1 %v1983_v34  ;;  %v1989_v34 = vpack.c.bf16 %v1917_v18, %v1915_v11  ;;  %v2298_v11 = vld [vmem:[#allocation2 + $0x8b0] ss:$8 sm:$0x3] }
 0x4dd   : > { %2103 = vmatmul.mubr.bf16.gmra.mrb[68].mxu1 %v1975_v12  ;;  %v1988_v12 = vpack.c.bf16 %v1916_v8, %v1914_v47 }
 0x4de   : > { %2136 = vmatpush1.bf16.msra.mxu1 %v1982_v49  ;;  %2112 = vmatprep.mubr.bf16.mxu1 %v3437_v1  ;;  %v1991_v49 = vpack.c.bf16 %v1921_v3, %v1919_v46 }
 0x4df   : > { %2137 = vmatprep.subr.bf16.mxu1 %v1985_v53  ;;  %v1918_v53 = vld [vmem:[#allocation2 + $0x770] sm:$0xff] }
 0x4e1   : > { %2083 = vmatmul.mubr.bf16.gmra.mrb[96].mxu0 %v1973_v62  ;;  %v1990_v62 = vpack.c.bf16 %v1920_v35, %v1918_v53 }
 0x4e2   : > { %2138 = vmatpush1.bf16.msra.mxu1 %v1984_v37  ;;  %v1922_v37 = vld [vmem:[#allocation2 + $0x790] sm:$0xff] }
 0x4e3   : > { %2139 = vmatprep.subr.bf16.mxu1 %v1987_v39  ;;  %v1924_v39 = vld [vmem:[#allocation2 + $0x7a0] sm:$0xff] }
 0x4e5   : > { %2113 = vmatmul.mubr.bf16.gmra.mrb[72].mxu1 %v1976_v21  ;;  %v1992_v21 = vpack.c.bf16 %v1924_v39, %v1922_v37 }
 0x4e6   : > { %2140 = vmatpush1.bf16.msra.mxu1 %v1986_v33  ;;  %2122 = vmatprep.mubr.bf16.mxu1 %v3437_v1 }
 0x4e7   : > { %2141 = vmatprep.subr.bf16.mxu1 %v1989_v34  ;;  %v2300_v34 = vld [vmem:[#allocation2 + $0x8b1] ss:$8 sm:$0x3] }
 0x4e8   : > { %v4312_v35 = vrot.slane %v2300_v34, %v3584_v57  ;;  %v4319_v37 = vrot.slane %v2300_v34, %v3587_v58 }
 0x4ea   : > { %2142 = vmatpush1.bf16.msra.mxu1 %v1988_v12 }
 0x4eb   : > { %2143 = vmatprep.subr.bf16.mxu1 %v1991_v49  ;;  %v4309_v49 = vrot.slane %v2298_v11, %v3584_v57 }
 0x4ed   : > { %2123 = vmatmul.mubr.bf16.gmra.mrb[76].mxu1 %v3438_v56  ;;  %v1968_v56 = vpack.c.bf16 %v4226_v63, %v4226_v63 }
 0x4ee   : > { %2144 = vmatpush1.bf16.msra.mxu1 %v1990_v62  ;;  %2163 = vmatprep.mubr.bf16.mxu1 %v3437_v1  ;;  %v4316_v62 = vrot.slane %v2298_v11, %v3587_v58 }
 0x4ef   : > { %2145 = vmatprep.subr.bf16.mxu1 %v1993_v60 }
 0x4f2   : > { %2146 = vmatpush1.bf16.msra.mxu1 %v1992_v21 }
 0x4f5   : > { %2164 = vmatmul.mubr.bf16.vlgmr.msra.gmra.mrb[80].mxu1 %v1960_v6 }
 0x4f6   : > { %2173 = vmatprep.mubr.bf16.mxu1 %v3437_v1 }
 0x4fd   : > { %2174 = vmatmul.mubr.bf16.gmra.mrb[84].mxu1 %v1961_v43 }
 0x4fe   : > { %2183 = vmatprep.mubr.bf16.mxu1 %v3437_v1 }
 0x505   : > { %2184 = vmatmul.mubr.bf16.gmra.mrb[88].mxu1 %v1962_v2 }
 0x506   : > { %2193 = vmatprep.mubr.bf16.mxu1 %v3437_v1 }
 0x50d   : > { %2194 = vmatmul.mubr.bf16.gmra.mrb[92].mxu1 %v1963_v25 }
 0x50e   : > { %2203 = vmatprep.mubr.bf16.mxu1 %v3437_v1 }
 0x515   : > { %2204 = vmatmul.mubr.bf16.gmra.mrb[96].mxu1 %v1964_v5 }
 0x516   : > { %2213 = vmatprep.mubr.bf16.mxu1 %v3437_v1 }
 0x51d   : > { %2214 = vmatmul.mubr.bf16.gmra.mrb[64].mxu1 %v1965_v17 }
 0x51e   : > { %2223 = vmatprep.mubr.bf16.mxu1 %v3437_v1 }
 0x525   : > { %2224 = vmatmul.mubr.bf16.gmra.mrb[68].mxu1 %v1966_v28 }
 0x526   : > { %2233 = vmatprep.mubr.bf16.mxu1 %v3437_v1 }
 0x52d   : > { %2234 = vmatmul.mubr.bf16.gmra.mrb[72].mxu1 %v1967_v15  ;;  %v1959_v15 = vld [vmem:[#allocation4 + $0x6] ss:$8 sm:$0x3] }
 0x52e   : > { %2243 = vmatprep.mubr.bf16.mxu1 %v3437_v1  ;;  %v4302_v10 = vrot.slane %v1959_v15, %v3584_v57  ;;  %v4305_v33 = vrot.slane %v1959_v15, %v3587_v58 }
 0x535   : > { %2244 = vmatmul.mubr.bf16.gmra.mrb[100].mxu1 %v1968_v56 }
 0x594   : > { %v2044_v22 = vpop.f32.mrb[80].mxu0 }
 0x595   : > { %v2046_v23 = vpop.f32.mrb[81].mxu0 }
 0x596   : > { %v2048_v59 = vpop.f32.mrb[82].mxu0 }
 0x597   : > { %v2050_v9 = vpop.f32.mrb[83].mxu0 }
 0x59c   : > { %v2054_v31 = vpop.f32.mrb[84].mxu0 }
 0x59d   : > { %v2056_v43 = vpop.f32.mrb[85].mxu0 }
 0x59e   : > { %v2058_v13 = vpop.f32.mrb[86].mxu0 }
 0x59f   : > { %v2060_v48 = vpop.f32.mrb[87].mxu0 }
 0x5a4   : > { %v4273_v2 = vpop.f32.mrb[88].mxu0 }
 0x5a5   : > { %v4275_v19 = vpop.f32.mrb[89].mxu0 }
 0x5a6   : > { %v4277_v24 = vpop.f32.mrb[90].mxu0 }
 0x5a7   : > { %v4279_v25 = vpop.f32.mrb[91].mxu0 }
 0x5ac   : > { %v4281_v1 = vpop.f32.mrb[92].mxu0 }
 0x5ad   : > { %v4283_v40 = vpop.f32.mrb[93].mxu0 }
 0x5ae   : > { %v4285_v52 = vpop.f32.mrb[94].mxu0 }
 0x5af   : > { %v4287_v5 = vpop.f32.mrb[95].mxu0 }
 0x5b4   : > { %v4289_v61 = vpop.f32.mrb[96].mxu0 }
 0x5b5   : > { %v4291_v14 = vpop.f32.mrb[97].mxu0 }
 0x5b6   : > { %v4293_v17 = vpop.f32.mrb[98].mxu0 }
 0x5b7   : > { %v4295_v54 = vpop.f32.mrb[99].mxu0 }
 0x5c0   : > { %v4297_v0 = vpop.f32.mrb[76].mxu1 }
 0x5c1   : > { %v4299_v28 = vpop.f32.mrb[77].mxu1 }
 0x5c2   : > { %v2128_v63 = vpop.f32.mrb[78].mxu1 }
 0x5c3   : > { %v2129_v7 = vpop.f32.mrb[79].mxu1 }
 0x5c8   : > { %v2165_v18 = vpop.f32.mrb[80].mxu1 }
 0x5c9   : > { %v2166_v47 = vadd.f32 %v2165_v18, %v2044_v22  ;;  %v2167_v8 = vpop.f32.mrb[81].mxu1 }
 0x5ca   : > { %v2168_v46 = vadd.f32 %v2167_v8, %v2046_v23  ;;  %v2169_v3 = vpop.f32.mrb[82].mxu1 }
 0x5cb   : > { %v2263_v12 = vadd.f32 %v4302_v10, %v2166_v47  ;;  %v2170_v53 = vadd.f32 %v2169_v3, %v2048_v59  ;;  %v2171_v16 = vpop.f32.mrb[83].mxu1 }
 0x5cc   : > { %v2264_v44 = vadd.f32 %v4305_v33, %v2168_v46  ;;  %v2172_v60 = vadd.f32 %v2171_v16, %v2050_v9 }
 0x5cd   : > { %v2265_v39 = vadd.f32 %v4302_v10, %v2170_v53  ;;  %v2313_v6 = vmul.f32 %v4309_v49, %v2263_v12 }
 0x5ce   : > { %v2266_v21 = vadd.f32 %v4305_v33, %v2172_v60  ;;  %v2314_v57 = vmul.f32 %v4316_v62, %v2264_v44 }
 0x5cf   : > { %v2356_v56 = vmul.f32 %v4312_v35, %v2265_v39  ;;  %v2315_v3 = vmul.f32 %v4309_v49, %v2265_v39 }
 0x5d0   : > { %v2357_v22 = vmul.f32 %v4319_v37, %v2266_v21  ;;  %v2175_v23 = vpop.f32.mrb[84].mxu1 }
 0x5d1   : > { %v2176_v59 = vadd.f32 %v2175_v23, %v2054_v31  ;;  %v2177_v63 = vpop.f32.mrb[85].mxu1  ;;  %v2388_v7 = vadd.f32 %v2356_v56, %v2313_v6  ;;  %v2316_v31 = vmul.f32 %v4316_v62, %v2266_v21 }
 0x5d2   : > { %v2178_v9 = vadd.f32 %v2177_v63, %v2056_v43  ;;  %v2179_v15 = vpop.f32.mrb[86].mxu1  ;;  %v2389_v58 = vadd.f32 %v2357_v22, %v2314_v57 }
 0x5d3   : > { %v2267_v11 = vadd.f32 %v4302_v10, %v2176_v59  ;;  %v2180_v18 = vadd.f32 %v2179_v15, %v2058_v13  ;;  %v2181_v34 = vpop.f32.mrb[87].mxu1 }
 0x5d4   : > { %v2268_v47 = vadd.f32 %v4305_v33, %v2178_v9  ;;  %v2182_v8 = vadd.f32 %v2181_v34, %v2060_v48  ;;  %v2420_v46 = vadd.f32 %v2389_v58, %v2388_v7 }
 0x5d5   : > { %v2358_v12 = vmul.f32 %v4312_v35, %v2267_v11  ;;  %v2269_v53 = vadd.f32 %v4302_v10, %v2180_v18  ;;  %v2317_v13 = vmul.f32 %v4309_v49, %v2267_v11 }
 0x5d6   : > { %v2359_v43 = vmul.f32 %v4319_v37, %v2268_v47  ;;  %v2270_v16 = vadd.f32 %v4305_v33, %v2182_v8  ;;  %2421 = vadd.xlane.f32.xlu0 %v2420_v46  ;;  %v2318_v48 = vmul.f32 %v4316_v62, %v2268_v47 }
 0x5d7   : > { %v2360_v44 = vmul.f32 %v4312_v35, %v2269_v53  ;;  %v2390_v60 = vadd.f32 %v2358_v12, %v2315_v3 }
 0x5d8   : > { %v2361_v39 = vmul.f32 %v4319_v37, %v2270_v16  ;;  %v2185_v6 = vpop.f32.mrb[88].mxu1  ;;  %v2391_v56 = vadd.f32 %v2359_v43, %v2316_v31  ;;  %v2320_v8 = vmul.f32 %v4316_v62, %v2270_v16 }
 0x5d9   : > { %v2186_v57 = vadd.f32 %v2185_v6, %v4273_v2  ;;  %v2187_v22 = vpop.f32.mrb[89].mxu1  ;;  %v2392_v21 = vadd.f32 %v2360_v44, %v2317_v13  ;;  %v2319_v2 = vmul.f32 %v4309_v49, %v2269_v53 }
 0x5da   : > { %v2188_v23 = vadd.f32 %v2187_v22, %v4275_v19  ;;  %v2189_v59 = vpop.f32.mrb[90].mxu1  ;;  %v2423_v63 = vadd.f32 %v2391_v56, %v2390_v60  ;;  %v2393_v7 = vadd.f32 %v2361_v39, %v2318_v48 }
 0x5db   : > { %v2271_v9 = vadd.f32 %v4302_v10, %v2186_v57  ;;  %v2190_v15 = vadd.f32 %v2189_v59, %v4277_v24  ;;  %v2191_v58 = vpop.f32.mrb[91].mxu1 }
 0x5dc   : > { %v2272_v11 = vadd.f32 %v4305_v33, %v2188_v23  ;;  %v2192_v18 = vadd.f32 %v2191_v58, %v4279_v25  ;;  %2424 = vadd.xlane.f32.xlu1 %v2423_v63  ;;  %v2426_v34 = vadd.f32 %v2393_v7, %v2392_v21 }
 0x5dd   : > { %v2362_v47 = vmul.f32 %v4312_v35, %v2271_v9  ;;  %v2273_v19 = vadd.f32 %v4302_v10, %v2190_v15  ;;  %v2321_v24 = vmul.f32 %v4309_v49, %v2271_v9 }
 0x5de   : > { %v2363_v46 = vmul.f32 %v4319_v37, %v2272_v11  ;;  %v2274_v3 = vadd.f32 %v4305_v33, %v2192_v18  ;;  %v2322_v25 = vmul.f32 %v4316_v62, %v2272_v11 }
 0x5df   : > { %v2364_v12 = vmul.f32 %v4312_v35, %v2273_v19  ;;  %v2394_v31 = vadd.f32 %v2362_v47, %v2319_v2 }
 0x5e0   : > { %v2365_v43 = vmul.f32 %v4319_v37, %v2274_v3  ;;  %v2195_v53 = vpop.f32.mrb[92].mxu1  ;;  %2427 = vadd.xlane.f32.xlu1 %v2426_v34  ;;  %v2395_v13 = vadd.f32 %v2363_v46, %v2320_v8  ;;  %v2324_v9 = vmul.f32 %v4316_v62, %v2274_v3 }
 0x5e1   : > { %v2196_v44 = vadd.f32 %v2195_v53, %v4281_v1  ;;  %v2197_v60 = vpop.f32.mrb[93].mxu1  ;;  %v2396_v16 = vadd.f32 %v2364_v12, %v2321_v24  ;;  %v2323_v1 = vmul.f32 %v4309_v49, %v2273_v19 }
 0x5e2   : > { %v2198_v48 = vadd.f32 %v2197_v60, %v4283_v40  ;;  %v2199_v39 = vpop.f32.mrb[94].mxu1  ;;  %v2429_v6 = vadd.f32 %v2395_v13, %v2394_v31  ;;  %v2397_v56 = vadd.f32 %v2365_v43, %v2322_v25 }
 0x5e3   : > { %v2275_v57 = vadd.f32 %v4302_v10, %v2196_v44  ;;  %v2200_v22 = vadd.f32 %v2199_v39, %v4285_v52  ;;  %v2201_v21 = vpop.f32.mrb[95].mxu1 }
 0x5e4   : > { %v2276_v23 = vadd.f32 %v4305_v33, %v2198_v48  ;;  %v2202_v59 = vadd.f32 %v2201_v21, %v4287_v5  ;;  %2430 = vadd.xlane.f32.xlu1 %v2429_v6  ;;  %v2432_v63 = vadd.f32 %v2397_v56, %v2396_v16 }
 0x5e5   : > { %v2366_v7 = vmul.f32 %v4312_v35, %v2275_v57  ;;  %v2277_v40 = vadd.f32 %v4302_v10, %v2200_v22  ;;  %v2325_v52 = vmul.f32 %v4309_v49, %v2275_v57 }
 0x5e6   : > { %v2367_v15 = vmul.f32 %v4319_v37, %v2276_v23  ;;  %v2278_v58 = vadd.f32 %v4305_v33, %v2202_v59  ;;  %v2326_v5 = vmul.f32 %v4316_v62, %v2276_v23 }
 0x5e7   : > { %v2368_v11 = vmul.f32 %v4312_v35, %v2277_v40  ;;  %v2398_v18 = vadd.f32 %v2366_v7, %v2323_v1 }
 0x5e8   : > { %v2369_v34 = vmul.f32 %v4319_v37, %v2278_v58  ;;  %v2205_v2 = vpop.f32.mrb[96].mxu1  ;;  %2433 = vadd.xlane.f32.xlu1 %v2432_v63  ;;  %v2399_v47 = vadd.f32 %v2367_v15, %v2324_v9  ;;  %v2328_v48 = vmul.f32 %v4316_v62, %v2278_v58 }
 0x5e9   : > { %v2206_v19 = vadd.f32 %v2205_v2, %v4289_v61  ;;  %v2207_v8 = vpop.f32.mrb[97].mxu1  ;;  %v2400_v46 = vadd.f32 %v2368_v11, %v2325_v52  ;;  %v2327_v61 = vmul.f32 %v4309_v49, %v2277_v40 }
 0x5ea   : > { %v2208_v3 = vadd.f32 %v2207_v8, %v4291_v14  ;;  %v2209_v24 = vpop.f32.mrb[98].mxu1  ;;  %v2435_v12 = vadd.f32 %v2399_v47, %v2398_v18  ;;  %v2401_v31 = vadd.f32 %v2369_v34, %v2326_v5 }
 0x5eb   : > { %v2279_v25 = vadd.f32 %v4302_v10, %v2206_v19  ;;  %v2210_v43 = vadd.f32 %v2209_v24, %v4293_v17  ;;  %v2211_v53 = vpop.f32.mrb[99].mxu1 }
 0x5ec   : > { %v2280_v13 = vadd.f32 %v4305_v33, %v2208_v3  ;;  %v2212_v44 = vadd.f32 %v2211_v53, %v4295_v54  ;;  %2436 = vadd.xlane.f32.xlu1 %v2435_v12  ;;  %v2438_v60 = vadd.f32 %v2401_v31, %v2400_v46 }
 0x5ed   : > { %v2370_v16 = vmul.f32 %v4312_v35, %v2279_v25  ;;  %v2281_v14 = vadd.f32 %v4302_v10, %v2210_v43  ;;  %v2329_v17 = vmul.f32 %v4309_v49, %v2279_v25 }
 0x5ee   : > { %v2371_v39 = vmul.f32 %v4319_v37, %v2280_v13  ;;  %v2282_v6 = vadd.f32 %v4305_v33, %v2212_v44  ;;  %v2330_v54 = vmul.f32 %v4316_v62, %v2280_v13 }
 0x5ef   : > { %v2372_v56 = vmul.f32 %v4312_v35, %v2281_v14  ;;  %v2402_v57 = vadd.f32 %v2370_v16, %v2327_v61  ;;  %v2331_v58 = vmul.f32 %v4309_v49, %v2281_v14 }
 0x5f0   : > { %v2373_v22 = vmul.f32 %v4319_v37, %v2282_v6  ;;  %v2215_v21 = vpop.f32.mrb[64].mxu1  ;;  %2439 = vadd.xlane.f32.xlu1 %v2438_v60  ;;  %v2403_v23 = vadd.f32 %v2371_v39, %v2328_v48  ;;  %v2332_v5 = vmul.f32 %v4316_v62, %v2282_v6 }
 0x5f1   : > { %v2283_v59 = vadd.f32 %v4302_v10, %v2215_v21  ;;  %v2217_v63 = vpop.f32.mrb[65].mxu1  ;;  %v2404_v1 = vadd.f32 %v2372_v56, %v2329_v17 }
 0x5f2   : > { %v2284_v7 = vadd.f32 %v4305_v33, %v2217_v63  ;;  %v2219_v40 = vpop.f32.mrb[66].mxu1  ;;  %v2441_v9 = vadd.f32 %v2403_v23, %v2402_v57  ;;  %v2405_v15 = vadd.f32 %v2373_v22, %v2330_v54 }
 0x5f3   : > { %v2374_v52 = vmul.f32 %v4312_v35, %v2283_v59  ;;  %v2285_v11 = vadd.f32 %v4302_v10, %v2219_v40  ;;  %v2221_v18 = vpop.f32.mrb[67].mxu1  ;;  %v2333_v19 = vmul.f32 %v4309_v49, %v2283_v59 }
 0x5f4   : > { %v2375_v34 = vmul.f32 %v4319_v37, %v2284_v7  ;;  %v2286_v2 = vadd.f32 %v4305_v33, %v2221_v18  ;;  %2442 = vadd.xlane.f32.xlu1 %v2441_v9  ;;  %v2444_v47 = vadd.f32 %v2405_v15, %v2404_v1  ;;  %v2334_v3 = vmul.f32 %v4316_v62, %v2284_v7 }
 0x5f5   : > { %v2376_v8 = vmul.f32 %v4312_v35, %v2285_v11  ;;  %v2406_v46 = vadd.f32 %v2374_v52, %v2331_v58  ;;  %v2335_v14 = vmul.f32 %v4309_v49, %v2285_v11 }
 0x5f6   : > { %v2377_v24 = vmul.f32 %v4319_v37, %v2286_v2  ;;  %2445 = vadd.xlane.f32.xlu0 %v2444_v47  ;;  %v2407_v12 = vadd.f32 %v2375_v34, %v2332_v5  ;;  %v2336_v17 = vmul.f32 %v4316_v62, %v2286_v2 }
 0x5f7   : > { %v2408_v31 = vadd.f32 %v2376_v8, %v2333_v19 }
 0x5f8   : > { %v2225_v25 = vpop.f32.mrb[68].mxu1  ;;  %v2447_v43 = vadd.f32 %v2407_v12, %v2406_v46  ;;  %v2409_v53 = vadd.f32 %v2377_v24, %v2334_v3  ;;  %v3360_v12 = vld [vmem:[#allocation4 + $0x3] ss:$0 sm:$0xff] }
 0x5f9   : > { %v2287_v13 = vadd.f32 %v4302_v10, %v2225_v25  ;;  %v2227_v44 = vpop.f32.mrb[69].mxu1 }
 0x5fa   : > { %v2288_v60 = vadd.f32 %v4305_v33, %v2227_v44  ;;  %v2229_v61 = vpop.f32.mrb[70].mxu1  ;;  %2448 = vadd.xlane.f32.xlu0 %v2447_v43  ;;  %v2450_v16 = vadd.f32 %v2409_v53, %v2408_v31 }
 0x5fb   : > { %v2378_v48 = vmul.f32 %v4312_v35, %v2287_v13  ;;  %v2289_v39 = vadd.f32 %v4302_v10, %v2229_v61  ;;  %v2231_v6 = vpop.f32.mrb[71].mxu1  ;;  %v2337_v54 = vmul.f32 %v4309_v49, %v2287_v13 }
 0x5fc   : > { %v2379_v56 = vmul.f32 %v4319_v37, %v2288_v60  ;;  %v2290_v57 = vadd.f32 %v4305_v33, %v2231_v6  ;;  %v2338_v23 = vmul.f32 %v4316_v62, %v2288_v60 }
 0x5fd   : > { %v2380_v22 = vmul.f32 %v4312_v35, %v2289_v39  ;;  %v2410_v21 = vadd.f32 %v2378_v48, %v2335_v14  ;;  %v2339_v5 = vmul.f32 %v4309_v49, %v2289_v39 }
 0x5fe   : > { %v2381_v59 = vmul.f32 %v4319_v37, %v2290_v57  ;;  %2451 = vadd.xlane.f32.xlu0 %v2450_v16  ;;  %v2411_v63 = vadd.f32 %v2379_v56, %v2336_v17  ;;  %v2340_v19 = vmul.f32 %v4316_v62, %v2290_v57 }
 0x5ff   : > { %v2412_v1 = vadd.f32 %v2380_v22, %v2337_v54 }
 0x600   : > { %v2235_v7 = vpop.f32.mrb[72].mxu1  ;;  %v2453_v40 = vadd.f32 %v2411_v63, %v2410_v21  ;;  %v2413_v9 = vadd.f32 %v2381_v59, %v2338_v23  ;;  %v2301_v63 = vld [vmem:[#allocation4 + $0x7] ss:$0 sm:$0xff] }
 0x601   : > { %v2291_v15 = vadd.f32 %v4302_v10, %v2235_v7  ;;  %v2237_v58 = vpop.f32.mrb[73].mxu1 }
 0x602   : > { %v2292_v52 = vadd.f32 %v4305_v33, %v2237_v58  ;;  %2454 = vadd.xlane.f32.xlu0 %v2453_v40  ;;  %v2239_v11 = vpop.f32.mrb[74].mxu1  ;;  %v2456_v18 = vadd.f32 %v2413_v9, %v2412_v1 }
 0x603   : > { %v2382_v34 = vmul.f32 %v4312_v35, %v2291_v15  ;;  %v2293_v2 = vadd.f32 %v4302_v10, %v2239_v11  ;;  %v2241_v47 = vpop.f32.mrb[75].mxu1  ;;  %v2341_v3 = vmul.f32 %v4309_v49, %v2291_v15 }
 0x604   : > { %v2383_v8 = vmul.f32 %v4319_v37, %v2292_v52  ;;  %v2294_v46 = vadd.f32 %v4305_v33, %v2241_v47  ;;  %v2342_v25 = vmul.f32 %v4316_v62, %v2292_v52 }
 0x605   : > { %v2384_v24 = vmul.f32 %v4312_v35, %v2293_v2  ;;  %1285 = vperm.xlu1 %3359, %v3360_v12   ;;  %v2414_v31 = vadd.f32 %v2382_v34, %v2339_v5  ;;  %v2343_v54 = vmul.f32 %v4309_v49, %v2293_v2 }
 0x606   : > { %v2385_v43 = vmul.f32 %v4319_v37, %v2294_v46  ;;  %2457 = vadd.xlane.f32.xlu0 %v2456_v18  ;;  %v2415_v53 = vadd.f32 %v2383_v8, %v2340_v19  ;;  %v2344_v21 = vmul.f32 %v4316_v62, %v2294_v46 }
 0x607   : > { %v2416_v13 = vadd.f32 %v2384_v24, %v2341_v3 }
 0x608   : > { %v2245_v44 = vpop.f32.mrb[100].mxu1  ;;  %v2459_v60 = vadd.f32 %v2415_v53, %v2414_v31  ;;  %v2417_v61 = vadd.f32 %v2385_v43, %v2342_v25 }
 0x609   : > { %v2246_v16 = vadd.f32 %v2245_v44, %v4297_v0  ;;  %v2247_v14 = vpop.f32.mrb[101].mxu1 }
 0x60a   : > { %v2248_v48 = vadd.f32 %v2247_v14, %v4299_v28  ;;  %2460 = vadd.xlane.f32.xlu0 %v2459_v60  ;;  %v2249_v39 = vpop.f32.mrb[102].mxu1  ;;  %v2462_v6 = vadd.f32 %v2417_v61, %v2416_v13 }
 0x60b   : > { %v2295_v17 = vadd.f32 %v4302_v10, %v2246_v16  ;;  %v2250_v56 = vpop.f32.mrb[103].mxu1 }
 0x60c   : > { %v2296_v57 = vadd.f32 %v4305_v33, %v2248_v48 }
 0x60d   : > { %v2386_v22 = vmul.f32 %v4312_v35, %v2295_v17 }
 0x60e   : > { %v2387_v23 = vmul.f32 %v4319_v37, %v2296_v57  ;;  %2463 = vadd.xlane.f32.xlu0 %v2462_v6 }
 0x60f   : > { %v2418_v0 = vadd.f32 %v2386_v22, %v2343_v54 }
 0x610   : > { %v2419_v59 = vadd.f32 %v2387_v23, %v2344_v21 }
 0x612   : > { %v2465_v28 = vadd.f32 %v2419_v59, %v2418_v0 }
 0x614   : > { %2466 = vadd.xlane.f32.xlu0 %v2465_v28 }
 0x62a   : > { %2470 = vperm.xlu0 %3358, %v2301_v63  }
 0x663   : > { %v4443_v37 = vpop.xlane.xlu0 %2421 }
 0x669   : > { %v4431_v1 = vpop.xlane.xlu1 %2424 }
 0x66d   : > { %v4433_v10 = vpop.xlane.xlu1 %2427 }
 0x671   : > { %v4435_v33 = vpop.xlane.xlu1 %2430 }
 0x675   : > { %v4437_v49 = vpop.xlane.xlu1 %2433 }
 0x679   : > { %v4439_v35 = vpop.xlane.xlu1 %2436 }
 0x67d   : > { %v4441_v62 = vpop.xlane.xlu1 %2439 }
 0x681   : > { %v4445_v7 = vpop.xlane.xlu1 %2442 }
 0x683   : > { %v4447_v40 = vpop.xlane.xlu0 %2445 }
 0x685   : > { %v1286_v9 = vpop.permute.xlu1 %1285 }
 0x686   : > { %v1288_v15 = vadd.f32 %v1286_v9, %v3941_v50  ;;  %v1289_v58 = vadd.f32 %v1286_v9, %v3944_v20  ;;  %v1290_v52 = vadd.f32 %v1286_v9, %v3947_v27  ;;  %v1296_v18 = vadd.f32 %v1286_v9, %v3965_v41 }
 0x687   : > { %v2449_v11 = vpop.xlane.xlu0 %2448  ;;  %v1297_v5 = vadd.f32 %v1286_v9, %v3968_v42  ;;  %v1298_v34 = vadd.f32 %v1286_v9, %v3971_v45  ;;  %v1291_v2 = vadd.f32 %v1286_v9, %v3950_v30  ;;  %v1299_v50 = vadd.f32 %v1286_v9, %v3977_v51 }
 0x688   : > { %v1321_v20 = vrot.slane %v1288_v15, %v3558_v4  ;;  %v1325_v27 = vrot.slane %v1289_v58, %v3558_v4  ;;  %v1292_v47 = vadd.f32 %v1286_v9, %v3953_v32  ;;  %v1300_v19 = vadd.f32 %v1286_v9, %v3980_v36 }
 0x689   : > { %v1329_v41 = vrot.slane %v1290_v52, %v3558_v4  ;;  %v1293_v8 = vadd.f32 %v1286_v9, %v3956_v26  ;;  %v1301_v42 = vadd.f32 %v1286_v9, %v3983_v55  ;;  %v1353_v45 = vrot.slane %v1296_v18, %v3558_v4 }
 0x68a   : > { %v1357_v30 = vrot.slane %v1297_v5, %v3558_v4  ;;  %v1294_v46 = vadd.f32 %v1286_v9, %v3959_v38  ;;  %v1295_v32 = vadd.f32 %v1286_v9, %v3962_v29  ;;  %v1361_v36 = vrot.slane %v1298_v34, %v3558_v4 }
 0x68b   : > { %v2452_v51 = vpop.xlane.xlu0 %2451  ;;  %v1333_v3 = vrot.slane %v1291_v2, %v3558_v4  ;;  %v1365_v26 = vrot.slane %v1299_v50, %v3558_v4  ;;  %v1375_v55 = vsel %vm1374_vm2, %v1325_v27, %v1321_v20  ;;  %v1337_v12 = vrot.slane %v1292_v47, %v3558_v4 }
 0x68c   : > { %v1388_v24 = vsel %vm1374_vm2, %v1357_v30, %v1353_v45  ;;  %v1369_v31 = vrot.slane %v1300_v19, %v3558_v4  ;;  %v1377_v25 = vsel %vm1376_vm3, %v1329_v41, %v1375_v55  ;;  %v1341_v29 = vrot.slane %v1293_v8, %v3558_v4 }
 0x68d   : > { %v1389_v38 = vsel %vm1376_vm3, %v1361_v36, %v1388_v24  ;;  %v1373_v43 = vrot.slane %v1301_v42, %v3558_v4  ;;  %v1379_v53 = vsel %vm1378_vm4, %v1333_v3, %v1377_v25  ;;  %v1345_v60 = vrot.slane %v1294_v46, %v3558_v4 }
 0x68e   : > { %v1390_v13 = vsel %vm1378_vm4, %v1365_v26, %v1389_v38  ;;  %v1381_v61 = vsel %vm1380_vm5, %v1337_v12, %v1379_v53  ;;  %v1349_v14 = vrot.slane %v1295_v32, %v3558_v4 }
 0x68f   : > { %v2455_v44 = vpop.xlane.xlu0 %2454  ;;  %v1391_v16 = vsel %vm1380_vm5, %v1369_v31, %v1390_v13  ;;  %v1383_v48 = vsel %vm1382_vm6, %v1341_v29, %v1381_v61 }
 0x690   : > { %v1392_v39 = vsel %vm1382_vm6, %v1373_v43, %v1391_v16  ;;  %v1385_v6 = vsel %vm1384_vm7, %v1345_v60, %v1383_v48 }
 0x691   : > { %1398 = vst.msk [vmem:[%s233_s28 + $0x8] sm:$0x3f] %vm1397_vm8, %v1392_v39  ;;  %v1387_v17 = vsel %vm1386_vm9, %v1349_v14, %v1385_v6 }
 0x692   : > { %1396 = vst.msk [vmem:[%s233_s28] sm:$0xff] %vm1395_vm10, %v1387_v17 }
 0x693   : > { %v2458_v56 = vpop.xlane.xlu0 %2457 }
 0x697   : > { %v2461_v57 = vpop.xlane.xlu0 %2460 }
 0x69b   : > { %v2464_v54 = vpop.xlane.xlu0 %2463 }
 0x6a1   : > { %v2467_v22 = vpop.xlane.xlu0 %2466 }
 0x6a9   : > { %v2471_v21 = vpop.permute.xlu0 %2470 }
 0x6aa   : > { %v2473_v23 = vadd.f32 %v2471_v21, %v4443_v37  ;;  %v2474_v0 = vadd.f32 %v2471_v21, %v4431_v1  ;;  %v2475_v59 = vadd.f32 %v2471_v21, %v4433_v10  ;;  %v2481_v28 = vadd.f32 %v2471_v21, %v4447_v40 }
 0x6ab   : > { %v2482_v63 = vadd.f32 %v2471_v21, %v2449_v11  ;;  %v2483_v9 = vadd.f32 %v2471_v21, %v2452_v51  ;;  %v2476_v15 = vadd.f32 %v2471_v21, %v4435_v33  ;;  %v2484_v58 = vadd.f32 %v2471_v21, %v2455_v44 }
 0x6ac   : > { %v2508_v52 = vrot.slane %v2473_v23, %v3558_v4  ;;  %v2512_v18 = vrot.slane %v2474_v0, %v3558_v4  ;;  %v2477_v5 = vadd.f32 %v2471_v21, %v4437_v49  ;;  %v2478_v34 = vadd.f32 %v2471_v21, %v4439_v35 }
 0x6ad   : > { %v2485_v37 = vadd.f32 %v2471_v21, %v2458_v56  ;;  %v2516_v1 = vrot.slane %v2475_v59, %v3558_v4  ;;  %v2486_v2 = vadd.f32 %v2471_v21, %v2461_v57  ;;  %v2540_v10 = vrot.slane %v2481_v28, %v3558_v4 }
 0x6ae   : > { %v2544_v40 = vrot.slane %v2482_v63, %v3558_v4  ;;  %v2548_v11 = vrot.slane %v2483_v9, %v3558_v4  ;;  %v2479_v33 = vadd.f32 %v2471_v21, %v4441_v62  ;;  %v2480_v50 = vadd.f32 %v2471_v21, %v4445_v7 }
 0x6af   : > { %v2487_v20 = vadd.f32 %v2471_v21, %v2464_v54  ;;  %v2488_v27 = vadd.f32 %v2471_v21, %v2467_v22  ;;  %v2520_v49 = vrot.slane %v2476_v15, %v3558_v4  ;;  %v2552_v35 = vrot.slane %v2484_v58, %v3558_v4 }
 0x6b0   : > { %v2569_v47 = vsel %vm1374_vm2, %v2512_v18, %v2508_v52  ;;  %v2576_v19 = vsel %vm1374_vm2, %v2544_v40, %v2540_v10  ;;  %v2524_v41 = vrot.slane %v2477_v5, %v3558_v4  ;;  %v2556_v8 = vrot.slane %v2485_v37, %v3558_v4 }
 0x6b1   : > { %v2570_v42 = vsel %vm1376_vm3, %v2516_v1, %v2569_v47  ;;  %v2577_v62 = vsel %vm1376_vm3, %v2548_v11, %v2576_v19  ;;  %v2528_v7 = vrot.slane %v2478_v34, %v3558_v4  ;;  %v2560_v45 = vrot.slane %v2486_v2, %v3558_v4 }
 0x6b2   : > { %v2571_v30 = vsel %vm1378_vm4, %v2520_v49, %v2570_v42  ;;  %v2578_v51 = vsel %vm1378_vm4, %v2552_v35, %v2577_v62  ;;  %v2532_v46 = vrot.slane %v2479_v33, %v3558_v4  ;;  %v2564_v32 = vrot.slane %v2487_v20, %v3558_v4 }
 0x6b3   : > { %v2572_v36 = vsel %vm1380_vm5, %v2524_v41, %v2571_v30  ;;  %v2579_v3 = vsel %vm1380_vm5, %v2556_v8, %v2578_v51  ;;  %v2536_v26 = vrot.slane %v2480_v50, %v3558_v4  ;;  %v2568_v55 = vrot.slane %v2488_v27, %v3558_v4 }
 0x6b4   : > { %v2573_v24 = vsel %vm1382_vm6, %v2528_v7, %v2572_v36  ;;  %v2580_v12 = vsel %vm1382_vm6, %v2560_v45, %v2579_v3 }
 0x6b5   : > { %v2574_v31 = vsel %vm1384_vm7, %v2532_v46, %v2573_v24  ;;  %v2581_v25 = vsel %vm1384_vm7, %v2564_v32, %v2580_v12 }
 0x6b6   : > { %v2575_v38 = vsel %vm1386_vm9, %v2536_v26, %v2574_v31  ;;  %v2582_v29 = vsel %vm1386_vm9, %v2568_v55, %v2581_v25 }
 0x6b7   : > { %2585 = vst.msk [vmem:[%s238_s5] sm:$0xff] %vm1395_vm10, %v2575_v38  ;;  %2586 = vst.msk [vmem:[%s238_s5 + $0x8] sm:$0xff] %vm1395_vm10, %v2582_v29 }
 0x6b8 PF: > { %s17_s15 = sadd.s32 1, %s3431_s15  }
 0x6b9   : > { %p14_p5 = scmp.ge.s32.totalorder %s17_s15, 4  }
 0x6bb   :  { %16 = sbr.rel (!%p14_p5) target bundleno = 2 (0x2), region = 87 }
 0x6c2   :  { %2624 = vsyncpa [#allocation3], 1 }
 0x6c3   :  { %2626 = vsyncpa [#allocation3 + $0x1], 1 }
 0x6c4   :  { %2627 = vsyncpa [#allocation5], 1 }

</bundles_post_ra>
